<compile_context>
chip_gen: v6e
topology: v6e:2x2x1
jax: 0.10.0
libtpu: 0.0.40
codegen_flags: <defaults>
</compile_context>

<pallas_src>
import functools

import jax
import jax.numpy as jnp
from jax import lax
from jax.experimental import pallas as pl
from jax.experimental.pallas import tpu as pltpu


def _round_up(x, m):
    return ((x + m - 1) // m) * m


def _device_vmem_bytes():
    """Per-core VMEM capacity; conservative fallback if the query is unavailable."""
    try:
        return int(pltpu.get_tpu_info().vmem_capacity_bytes)
    except Exception:
        return 64 * 1024 * 1024  # v7x per-TC size: safe lower bound everywhere


def _decoder_kernel(clamp, with_r, with_scale, approx_recip, *refs):
    if with_r:
        (z_ref, w1_ref, b1_ref, ws_ref, bs_ref, wd_ref, bd_ref,
         wr_ref, br_ref, cell_ref, gene_ref) = refs[:11]
        out_refs = refs[11:]
    else:
        (z_ref, w1_ref, b1_ref, ws_ref, bs_ref, wd_ref, bd_ref,
         cell_ref, gene_ref) = refs[:9]
        wr_ref = br_ref = None
        out_refs = refs[9:]

    k = 0
    scale_ref = None
    if with_scale:
        scale_ref = out_refs[k]
        k += 1
    r_ref = None
    if with_r:
        r_ref = out_refs[k]
        k += 1
    rate_ref = out_refs[k]
    drop_ref = out_refs[k + 1]

    w_dt = w1_ref.dtype  # f32 or bf16 MXU operands; accumulation is always f32

    # ---- px_decoder: Linear (+ folded eval-mode BatchNorm1d) -> ReLU ----
    z = z_ref[...].astype(w_dt)
    h = jnp.dot(z, w1_ref[...], preferred_element_type=jnp.float32) + b1_ref[...]
    px = jnp.maximum(h, 0.0).astype(w_dt)

    # ---- px_dropout projection: write straight to its out ref ----
    drop = jnp.dot(px, wd_ref[...], preferred_element_type=jnp.float32) + bd_ref[...]
    drop_ref[...] = drop.astype(drop_ref.dtype)

    # ---- px_r projection (gene-cell only), optional clamp, direct store ----
    if with_r:
        r = jnp.dot(px, wr_ref[...], preferred_element_type=jnp.float32) + br_ref[...]
        if clamp is not None:
            r = jnp.clip(r, clamp[0], clamp[1])
        r_ref[...] = r.astype(r_ref.dtype)

    # ---- px_scale projection + softmax over the full (un-tiled) gene axis ----
    logits = jnp.dot(px, ws_ref[...], preferred_element_type=jnp.float32) + bs_ref[...]
    m = jnp.max(logits, axis=-1, keepdims=True)
    e = jnp.exp(logits - m)
    inv_denom = pl.reciprocal(jnp.sum(e, axis=-1, keepdims=True), approx=approx_recip)
    px_scale = e * inv_denom

    if with_scale:
        scale_ref[...] = px_scale.astype(scale_ref.dtype)
    # px_rate = exp(library=0) * cell_offset[:, None] * px_scale * gene_offset
    rate_ref[...] = (cell_ref[...] * px_scale * gene_ref[...]).astype(rate_ref.dtype)


def decoder_scvi_gene_cell(params, dispersion, z, *, cell_offset, gene_offset,
                           dispersion_clamp, tile_b=None,
                           weight_dtype=jnp.bfloat16,
                           out_dtype=jnp.float32,
                           rate_dtype=jnp.float32,
                           write_scale=True,
                           approx_recip=None):
    """Pallas implementation of DecoderSCVIGeneCell.forward (no categorical covariates)."""
    n, n_input = z.shape
    n_hidden = params["w1"].shape[1]
    n_output = params["ws"].shape[1]

    with_r = dispersion == "gene-cell"
    clamp = None
    if with_r and dispersion_clamp:
        clamp = (float(dispersion_clamp[0]), float(dispersion_clamp[1]))

    if approx_recip is None:
        # EUP approx reciprocal is free; keep exact math only for strict-f32 use.
        approx_recip = jnp.dtype(weight_dtype) != jnp.dtype(jnp.float32)

    # Fold eval-mode BatchNorm1d(eps=1e-3) into the first Linear (exact affine).
    eps = 1e-3
    s = params["bn_gamma"] * lax.rsqrt(params["bn_var"] + eps)            # (1, n_hidden)
    w1f = (params["w1"] * s).astype(weight_dtype)
    b1f = ((params["b1"] - params["bn_mean"]) * s + params["bn_beta"]).astype(jnp.float32)

    wsf = params["ws"].astype(weight_dtype)
    bsf = params["bs"].astype(jnp.float32)
    wdf = params["wd"].astype(weight_dtype)
    bdf = params["bd"].astype(jnp.float32)
    if with_r:
        wrf = params["wr"].astype(weight_dtype)
        brf = params["br"].astype(jnp.float32)

    cell2d = jnp.reshape(cell_offset, (n, 1)).astype(jnp.float32)
    gene2d = jnp.reshape(gene_offset, (1, n_output)).astype(jnp.float32)
    z32 = z.astype(jnp.float32)

    # ---------------- VMEM budgeting & adaptive batch tile ----------------
    n_proj = 3 if with_r else 2
    wbytes = jnp.dtype(weight_dtype).itemsize
    out_b = jnp.dtype(out_dtype).itemsize
    rate_b = jnp.dtype(rate_dtype).itemsize

    resident = (n_input * n_hidden + n_proj * n_hidden * n_output) * wbytes \
        + (n_hidden + n_proj * n_output + n_output) * 4            # biases + gene_offset
    out_row_bytes = n_output * (rate_b + out_b
                                + (out_b if write_scale else 0)
                                + (out_b if with_r else 0))
    per_row = 2 * (n_input + 1) * 4            # z + cell_offset (double-buffered)
    per_row += 2 * out_row_bytes               # output tiles (double-buffered)
    per_row += 2 * n_hidden * 4 + 5 * n_output * 4   # in-kernel f32 temporaries

    vmem_cap = _device_vmem_bytes()
    if tile_b is None:
        budget = vmem_cap - (12 << 20) - resident
        tb = budget // per_row if budget > 8 * per_row else 8
        tile_b = max(8, min(512, (int(tb) // 8) * 8))
    tile_b = max(8, _round_up(int(tile_b), 8))
    if n > 8:
        # >= 2 grid steps so the "parallel" batch axis can span both TCs on v7x.
        tile_b = min(tile_b, _round_up((n + 1) // 2, 8))
    tile_b = min(tile_b, _round_up(n, 8))
    grid = (pl.cdiv(n, tile_b),)

    # Cap the VMEM limit by the real device capacity (64 MiB on v7x, 128 on v5e/v6e).
    vmem_limit = int(min(max(resident + tile_b * per_row + (8 << 20), 32 << 20),
                         max(vmem_cap - (4 << 20), 16 << 20)))

    # ---------------- specs ----------------
    const_map = lambda i: (0, 0)
    row_map = lambda i: (i, 0)

    def _in_specs(single_buffer_weights):
        def resident_spec(shape):
            if single_buffer_weights:
                return pl.BlockSpec(shape, const_map, pipeline_mode=pl.Buffered(1))
            return pl.BlockSpec(shape, const_map)

        specs = [
            pl.BlockSpec((tile_b, n_input), row_map),       # z           (pipelined)
            resident_spec((n_input, n_hidden)),             # w1 folded   (resident)
            resident_spec((1, n_hidden)),                   # b1 folded
            resident_spec((n_hidden, n_output)),            # ws
            resident_spec((1, n_output)),                   # bs
            resident_spec((n_hidden, n_output)),            # wd
            resident_spec((1, n_output)),                   # bd
        ]
        if with_r:
            specs += [resident_spec((n_hidden, n_output)),  # wr
                      resident_spec((1, n_output))]         # br
        specs += [pl.BlockSpec((tile_b, 1), row_map),       # cell_offset (pipelined)
                  resident_spec((1, n_output))]             # gene_offset (resident)
        return specs

    inputs = [z32, w1f, b1f, wsf, bsf, wdf, bdf]
    if with_r:
        inputs += [wrf, brf]
    inputs += [cell2d, gene2d]

    out_shapes, out_specs = [], []
    if write_scale:
        out_shapes.append(jax.ShapeDtypeStruct((n, n_output), out_dtype))
        out_specs.append(pl.BlockSpec((tile_b, n_output), row_map))
    if with_r:
        out_shapes.append(jax.ShapeDtypeStruct((n, n_output), out_dtype))
        out_specs.append(pl.BlockSpec((tile_b, n_output), row_map))
    out_shapes.append(jax.ShapeDtypeStruct((n, n_output), rate_dtype))      # px_rate
    out_specs.append(pl.BlockSpec((tile_b, n_output), row_map))
    out_shapes.append(jax.ShapeDtypeStruct((n, n_output), out_dtype))       # px_dropout
    out_specs.append(pl.BlockSpec((tile_b, n_output), row_map))

    cost = pl.CostEstimate(
        flops=2 * n * n_hidden * (n_input + n_proj * n_output),
        transcendentals=n * n_output,
        bytes_accessed=int(n * (n_input + 1) * 4 + resident + n * out_row_bytes),
    )

    kernel = functools.partial(_decoder_kernel, clamp, with_r, write_scale,
                               bool(approx_recip))

    def _run(single_buffer_weights):
        return pl.pallas_call(
            kernel,
            out_shape=tuple(out_shapes),
            grid=grid,
            in_specs=_in_specs(single_buffer_weights),
            out_specs=tuple(out_specs),
            compiler_params=pltpu.CompilerParams(
                dimension_semantics=("parallel",),
                vmem_limit_bytes=vmem_limit),
            cost_estimate=cost,
        )(*inputs)

    try:
        outs = _run(True)       # single-buffered resident weights (preferred)
    except Exception:
        outs = _run(False)      # fallback: default double-buffered residents

    outs = list(outs)
    px_scale = outs.pop(0) if write_scale else None
    px_r = outs.pop(0) if with_r else None
    px_rate, px_dropout = outs
    return px_scale, px_r, px_rate, px_dropout


def init_params(key, n_input, n_output, n_hidden):
    """Deterministic synthetic parameters (shapes match the PyTorch module)."""
    ks = jax.random.split(key, 12)

    def linear(kw, kb, fan_in, fan_out):
        bound = 1.0 / jnp.sqrt(fan_in)
        w = jax.random.uniform(kw, (fan_in, fan_out), jnp.float32, -bound, bound)
        b = jax.random.uniform(kb, (1, fan_out), jnp.float32, -bound, bound)
        return w, b

    w1, b1 = linear(ks[0], ks[1], n_input, n_hidden)      # px_decoder Linear
    ws, bs = linear(ks[2], ks[3], n_hidden, n_output)     # px_scale_decoder Linear
    wr, br = linear(ks[4], ks[5], n_hidden, n_output)     # px_r_decoder
    wd, bd = linear(ks[6], ks[7], n_hidden, n_output)     # px_dropout_decoder
    return dict(
        w1=w1, b1=b1,
        bn_gamma=jax.random.uniform(ks[8], (1, n_hidden), jnp.float32, 0.8, 1.2),
        bn_beta=0.05 * jax.random.normal(ks[9], (1, n_hidden), jnp.float32),
        bn_mean=0.05 * jax.random.normal(ks[10], (1, n_hidden), jnp.float32),
        bn_var=jax.random.uniform(ks[11], (1, n_hidden), jnp.float32, 0.8, 1.25),
        ws=ws, bs=bs, wr=wr, br=br, wd=wd, bd=bd,
    )


def _reference(params, z, cell_offset, gene_offset, clamp):
    """Pure-JAX reference of the same forward pass (unfolded BN, separate matmuls)."""
    h = z @ params["w1"] + params["b1"]
    h = (h - params["bn_mean"]) / jnp.sqrt(params["bn_var"] + 1e-3) \
        * params["bn_gamma"] + params["bn_beta"]
    px = jnp.maximum(h, 0.0)
    px_scale = jax.nn.softmax(px @ params["ws"] + params["bs"], axis=-1)
    px_dropout = px @ params["wd"] + params["bd"]
    px_rate = jnp.exp(0.0) * cell_offset[:, None] * px_scale * gene_offset[None, :]
    px_r = px @ params["wr"] + params["br"]
    if clamp:
        px_r = jnp.clip(px_r, clamp[0], clamp[1])
    return px_scale, px_r, px_rate, px_dropout


if __name__ == "__main__":
    N, N_INPUT, N_HIDDEN, N_OUTPUT = 24, 16, 128, 256

    key = jax.random.PRNGKey(0)
    kp, kz, kc, kg = jax.random.split(key, 4)

    params = init_params(kp, N_INPUT, N_OUTPUT, N_HIDDEN)
    z = jax.random.normal(kz, (N, N_INPUT), jnp.float32)
    cell_offset = jax.random.uniform(kc, (N,), jnp.float32, 0.5, 2.0)
    gene_offset = jax.random.uniform(kg, (N_OUTPUT,), jnp.float32, 0.5, 2.0)
    dispersion_clamp = [-3.0, 3.0]

    ref = _reference(params, z, cell_offset, gene_offset, dispersion_clamp)
    names = ["px_scale", "px_r", "px_rate", "px_dropout"]

    # 1) gene-cell, f32 weights, explicit small tile (grid of 3): strict check.
    outs = decoder_scvi_gene_cell(
        params, "gene-cell", z, cell_offset=cell_offset, gene_offset=gene_offset,
        dispersion_clamp=dispersion_clamp, tile_b=8,
        weight_dtype=jnp.float32, approx_recip=False)
    outs = jax.block_until_ready(outs)
    for name, got, want in zip(names, outs, ref):
        assert got.shape == (N, N_OUTPUT), (name, got.shape)
        assert jnp.allclose(got, want, atol=2e-5, rtol=2e-5), name

    # 2) adaptive, VMEM-derived tile_b (>=2 grid steps on the batch axis): strict.
    outs_a = decoder_scvi_gene_cell(
        params, "gene-cell", z, cell_offset=cell_offset, gene_offset=gene_offset,
        dispersion_clamp=dispersion_clamp, tile_b=None,
        weight_dtype=jnp.float32, approx_recip=False)
    outs_a = jax.block_until_ready(outs_a)
    for name, got, want in zip(names, outs_a, ref):
        assert jnp.allclose(got, want, atol=2e-5, rtol=2e-5), name

    # 3) non-gene-cell path: px_r weights never read, matmul + writeback skipped.
    outs_g = decoder_scvi_gene_cell(
        params, "gene", z, cell_offset=cell_offset, gene_offset=gene_offset,
        dispersion_clamp=[], tile_b=8, weight_dtype=jnp.float32, approx_recip=False)
    outs_g = jax.block_until_ready(outs_g)
    assert outs_g[1] is None
    for idx in (0, 2, 3):
        assert jnp.allclose(outs_g[idx], ref[idx], atol=2e-5, rtol=2e-5), names[idx]

    # 4) bf16 weights + bf16 scale/dropout/r outputs (writeback traffic halved).
    outs_bf = decoder_scvi_gene_cell(
        params, "gene-cell", z, cell_offset=cell_offset, gene_offset=gene_offset,
        dispersion_clamp=dispersion_clamp, tile_b=8,
        weight_dtype=jnp.bfloat16, out_dtype=jnp.bfloat16)
    outs_bf = jax.block_until_ready(outs_bf)
    for name, got, want in zip(names, outs_bf, ref):
        got32 = got.astype(jnp.float32)
        assert bool(jnp.all(jnp.isfinite(got32))), name
        assert jnp.allclose(got32, want, atol=5e-2, rtol=5e-2), name
    assert jnp.allclose(jnp.sum(outs_bf[0].astype(jnp.float32), axis=-1), 1.0, atol=1e-2)

    # 5) skip the px_scale writeback when only px_rate is consumed downstream.
    outs_ns = decoder_scvi_gene_cell(
        params, "gene-cell", z, cell_offset=cell_offset, gene_offset=gene_offset,
        dispersion_clamp=dispersion_clamp, tile_b=8,
        weight_dtype=jnp.float32, approx_recip=False, write_scale=False)
    outs_ns = jax.block_until_ready(outs_ns)
    assert outs_ns[0] is None
    assert jnp.allclose(outs_ns[2], ref[2], atol=2e-5, rtol=2e-5)
    assert jnp.allclose(outs_ns[3], ref[3], atol=2e-5, rtol=2e-5)

    # 6) ragged batch (partial last tile; valid rows must still be exact).
    N2 = 20
    z2, c2 = z[:N2], cell_offset[:N2]
    ref2 = _reference(params, z2, c2, gene_offset, dispersion_clamp)
    outs_r = decoder_scvi_gene_cell(
        params, "gene-cell", z2, cell_offset=c2, gene_offset=gene_offset,
        dispersion_clamp=dispersion_clamp, tile_b=8,
        weight_dtype=jnp.float32, approx_recip=False)
    outs_r = jax.block_until_ready(outs_r)
    for name, got, want in zip(names, outs_r, ref2):
        assert got.shape == (N2, N_OUTPUT), (name, got.shape)
        assert jnp.allclose(got, want, atol=2e-5, rtol=2e-5), name

    print("KERNEL_OK")
</pallas_src>

<mosaic_0001>
module attributes {stable_mosaic.version = 11 : i64} {
  func.func @_decoder_kernel(%arg0: i32, %arg1: memref<8x16xf32, #tpu.memory_space<vmem>>, %arg2: memref<16x128xf32, #tpu.memory_space<vmem>>, %arg3: memref<1x128xf32, #tpu.memory_space<vmem>>, %arg4: memref<128x256xf32, #tpu.memory_space<vmem>>, %arg5: memref<1x256xf32, #tpu.memory_space<vmem>>, %arg6: memref<128x256xf32, #tpu.memory_space<vmem>>, %arg7: memref<1x256xf32, #tpu.memory_space<vmem>>, %arg8: memref<128x256xf32, #tpu.memory_space<vmem>>, %arg9: memref<1x256xf32, #tpu.memory_space<vmem>>, %arg10: memref<8x1xf32, #tpu.memory_space<vmem>>, %arg11: memref<1x256xf32, #tpu.memory_space<vmem>>, %arg12: memref<8x256xf32, #tpu.memory_space<vmem>>, %arg13: memref<8x256xf32, #tpu.memory_space<vmem>>, %arg14: memref<8x256xf32, #tpu.memory_space<vmem>>, %arg15: memref<8x256xf32, #tpu.memory_space<vmem>>) attributes {dimension_semantics = [#tpu.dimension_semantics<parallel>], iteration_bounds = array<i64: 3>, scalar_prefetch = 0 : i64, scratch_operands = 0 : i64, tpu.core_type = #tpu.core_type<tc>, window_params = [{transform_indices = @transform_0, window_bounds = array<i64: 8, 16>}, {pipeline_mode = #tpu.pipeline_mode<synchronous>, transform_indices = @transform_1, window_bounds = array<i64: 16, 128>}, {pipeline_mode = #tpu.pipeline_mode<synchronous>, transform_indices = @transform_2, window_bounds = array<i64: 1, 128>}, {pipeline_mode = #tpu.pipeline_mode<synchronous>, transform_indices = @transform_3, window_bounds = array<i64: 128, 256>}, {pipeline_mode = #tpu.pipeline_mode<synchronous>, transform_indices = @transform_4, window_bounds = array<i64: 1, 256>}, {pipeline_mode = #tpu.pipeline_mode<synchronous>, transform_indices = @transform_5, window_bounds = array<i64: 128, 256>}, {pipeline_mode = #tpu.pipeline_mode<synchronous>, transform_indices = @transform_6, window_bounds = array<i64: 1, 256>}, {pipeline_mode = #tpu.pipeline_mode<synchronous>, transform_indices = @transform_7, window_bounds = array<i64: 128, 256>}, {pipeline_mode = #tpu.pipeline_mode<synchronous>, transform_indices = @transform_8, window_bounds = array<i64: 1, 256>}, {transform_indices = @transform_9, window_bounds = array<i64: 8, 1>}, {pipeline_mode = #tpu.pipeline_mode<synchronous>, transform_indices = @transform_10, window_bounds = array<i64: 1, 256>}, {transform_indices = @transform_11, window_bounds = array<i64: 8, 256>}, {transform_indices = @transform_12, window_bounds = array<i64: 8, 256>}, {transform_indices = @transform_13, window_bounds = array<i64: 8, 256>}, {transform_indices = @transform_14, window_bounds = array<i64: 8, 256>}]} {
    %c0 = arith.constant 0 : index
    %c0_0 = arith.constant 0 : index
    %0 = vector.load %arg1[%c0, %c0_0] : memref<8x16xf32, #tpu.memory_space<vmem>>, vector<8x16xf32>
    %c0_1 = arith.constant 0 : index
    %c0_2 = arith.constant 0 : index
    %1 = vector.load %arg2[%c0_1, %c0_2] : memref<16x128xf32, #tpu.memory_space<vmem>>, vector<16x128xf32>
    %cst = arith.constant dense<0.000000e+00> : vector<8x128xf32>
    %2 = tpu.matmul %0, %1, %cst {dimension_numbers = #tpu.dot_dimension_numbers<[1], [0], [0], [1], [0, 0, 1, 1], [], []>} : vector<8x16xf32>, vector<16x128xf32>, vector<8x128xf32> -> vector<8x128xf32>
    %c0_3 = arith.constant 0 : index
    %c0_4 = arith.constant 0 : index
    %3 = vector.load %arg3[%c0_3, %c0_4] : memref<1x128xf32, #tpu.memory_space<vmem>>, vector<1x128xf32>
    %4 = vector.broadcast %3 : vector<1x128xf32> to vector<8x128xf32>
    %5 = arith.addf %2, %4 : vector<8x128xf32>
    %cst_5 = arith.constant 0.000000e+00 : f32
    %6 = vector.broadcast %cst_5 : f32 to vector<8x128xf32>
    %7 = arith.maximumf %5, %6 : vector<8x128xf32>
    %c0_6 = arith.constant 0 : index
    %c0_7 = arith.constant 0 : index
    %8 = vector.load %arg6[%c0_6, %c0_7] : memref<128x256xf32, #tpu.memory_space<vmem>>, vector<128x256xf32>
    %cst_8 = arith.constant dense<0.000000e+00> : vector<8x256xf32>
    %9 = tpu.matmul %7, %8, %cst_8 {dimension_numbers = #tpu.dot_dimension_numbers<[1], [0], [0], [1], [0, 0, 1, 1], [], []>} : vector<8x128xf32>, vector<128x256xf32>, vector<8x256xf32> -> vector<8x256xf32>
    %c0_9 = arith.constant 0 : index
    %c0_10 = arith.constant 0 : index
    %10 = vector.load %arg7[%c0_9, %c0_10] : memref<1x256xf32, #tpu.memory_space<vmem>>, vector<1x256xf32>
    %11 = vector.broadcast %10 : vector<1x256xf32> to vector<8x256xf32>
    %12 = arith.addf %9, %11 : vector<8x256xf32>
    %c0_11 = arith.constant 0 : index
    %c0_12 = arith.constant 0 : index
    %13 = vector.load %arg15[%c0_11, %c0_12] : memref<8x256xf32, #tpu.memory_space<vmem>>, vector<8x256xf32>
    tpu.vector_store %arg15[%c0_11, %c0_12], %12 {strides = array<i32>} : memref<8x256xf32, #tpu.memory_space<vmem>>, vector<8x256xf32>,
    %c0_13 = arith.constant 0 : index
    %c0_14 = arith.constant 0 : index
    %14 = vector.load %arg8[%c0_13, %c0_14] : memref<128x256xf32, #tpu.memory_space<vmem>>, vector<128x256xf32>
    %cst_15 = arith.constant dense<0.000000e+00> : vector<8x256xf32>
    %15 = tpu.matmul %7, %14, %cst_15 {dimension_numbers = #tpu.dot_dimension_numbers<[1], [0], [0], [1], [0, 0, 1, 1], [], []>} : vector<8x128xf32>, vector<128x256xf32>, vector<8x256xf32> -> vector<8x256xf32>
    %c0_16 = arith.constant 0 : index
    %c0_17 = arith.constant 0 : index
    %16 = vector.load %arg9[%c0_16, %c0_17] : memref<1x256xf32, #tpu.memory_space<vmem>>, vector<1x256xf32>
    %17 = vector.broadcast %16 : vector<1x256xf32> to vector<8x256xf32>
    %18 = arith.addf %15, %17 : vector<8x256xf32>
    %cst_18 = arith.constant -3.000000e+00 : f32
    %cst_19 = arith.constant 3.000000e+00 : f32
    %19 = vector.broadcast %cst_18 : f32 to vector<8x256xf32>
    %20 = arith.maximumf %19, %18 : vector<8x256xf32>
    %21 = vector.broadcast %cst_19 : f32 to vector<8x256xf32>
    %22 = arith.minimumf %21, %20 : vector<8x256xf32>
    %c0_20 = arith.constant 0 : index
    %c0_21 = arith.constant 0 : index
    %23 = vector.load %arg13[%c0_20, %c0_21] : memref<8x256xf32, #tpu.memory_space<vmem>>, vector<8x256xf32>
    tpu.vector_store %arg13[%c0_20, %c0_21], %22 {strides = array<i32>} : memref<8x256xf32, #tpu.memory_space<vmem>>, vector<8x256xf32>,
    %c0_22 = arith.constant 0 : index
    %c0_23 = arith.constant 0 : index
    %24 = vector.load %arg4[%c0_22, %c0_23] : memref<128x256xf32, #tpu.memory_space<vmem>>, vector<128x256xf32>
    %cst_24 = arith.constant dense<0.000000e+00> : vector<8x256xf32>
    %25 = tpu.matmul %7, %24, %cst_24 {dimension_numbers = #tpu.dot_dimension_numbers<[1], [0], [0], [1], [0, 0, 1, 1], [], []>} : vector<8x128xf32>, vector<128x256xf32>, vector<8x256xf32> -> vector<8x256xf32>
    %c0_25 = arith.constant 0 : index
    %c0_26 = arith.constant 0 : index
    %26 = vector.load %arg5[%c0_25, %c0_26] : memref<1x256xf32, #tpu.memory_space<vmem>>, vector<1x256xf32>
    %27 = vector.broadcast %26 : vector<1x256xf32> to vector<8x256xf32>
    %28 = arith.addf %25, %27 : vector<8x256xf32>
    %cst_27 = arith.constant dense<0xFF800000> : vector<8xf32>
    %29 = vector.multi_reduction <maximumf>, %28, %cst_27 [1] : vector<8x256xf32> to vector<8xf32>
    %30 = vector.shape_cast %29 : vector<8xf32> to vector<8x1xf32>
    %31 = vector.broadcast %30 : vector<8x1xf32> to vector<8x256xf32>
    %32 = arith.subf %28, %31 : vector<8x256xf32>
    %33 = math.exp %32 : vector<8x256xf32>
    %cst_28 = arith.constant dense<0.000000e+00> : vector<8xf32>
    %34 = vector.multi_reduction <add>, %33, %cst_28 [1] : vector<8x256xf32> to vector<8xf32>
    %35 = vector.shape_cast %34 : vector<8xf32> to vector<8x1xf32>
    %36 = tpu.reciprocal %35 : vector<8x1xf32> -> vector<8x1xf32>
    %37 = vector.broadcast %36 : vector<8x1xf32> to vector<8x256xf32>
    %38 = arith.mulf %33, %37 : vector<8x256xf32>
    %c0_29 = arith.constant 0 : index
    %c0_30 = arith.constant 0 : index
    %39 = vector.load %arg12[%c0_29, %c0_30] : memref<8x256xf32, #tpu.memory_space<vmem>>, vector<8x256xf32>
    tpu.vector_store %arg12[%c0_29, %c0_30], %38 {strides = array<i32>} : memref<8x256xf32, #tpu.memory_space<vmem>>, vector<8x256xf32>,
    %c0_31 = arith.constant 0 : index
    %c0_32 = arith.constant 0 : index
    %40 = vector.load %arg10[%c0_31, %c0_32] : memref<8x1xf32, #tpu.memory_space<vmem>>, vector<8x1xf32>
    %41 = vector.broadcast %40 : vector<8x1xf32> to vector<8x256xf32>
    %42 = arith.mulf %41, %38 : vector<8x256xf32>
    %c0_33 = arith.constant 0 : index
    %c0_34 = arith.constant 0 : index
    %43 = vector.load %arg11[%c0_33, %c0_34] : memref<1x256xf32, #tpu.memory_space<vmem>>, vector<1x256xf32>
    %44 = vector.broadcast %43 : vector<1x256xf32> to vector<8x256xf32>
    %45 = arith.mulf %42, %44 : vector<8x256xf32>
    %c0_35 = arith.constant 0 : index
    %c0_36 = arith.constant 0 : index
    %46 = vector.load %arg14[%c0_35, %c0_36] : memref<8x256xf32, #tpu.memory_space<vmem>>, vector<8x256xf32>
    tpu.vector_store %arg14[%c0_35, %c0_36], %45 {strides = array<i32>} : memref<8x256xf32, #tpu.memory_space<vmem>>, vector<8x256xf32>,
    return
  }
  func.func @transform_0(%arg0: i32) -> (i32, i32) {
    %c0_i32 = arith.constant 0 : i32
    %c0_i32_0 = arith.constant 0 : i32
    return %arg0, %c0_i32 : i32, i32
  }
  func.func @transform_1(%arg0: i32) -> (i32, i32) {
    %c0_i32 = arith.constant 0 : i32
    %c0_i32_0 = arith.constant 0 : i32
    %c0_i32_1 = arith.constant 0 : i32
    return %c0_i32, %c0_i32_0 : i32, i32
  }
  func.func @transform_2(%arg0: i32) -> (i32, i32) {
    %c0_i32 = arith.constant 0 : i32
    %c0_i32_0 = arith.constant 0 : i32
    %c0_i32_1 = arith.constant 0 : i32
    return %c0_i32, %c0_i32_0 : i32, i32
  }
  func.func @transform_3(%arg0: i32) -> (i32, i32) {
    %c0_i32 = arith.constant 0 : i32
    %c0_i32_0 = arith.constant 0 : i32
    %c0_i32_1 = arith.constant 0 : i32
    return %c0_i32, %c0_i32_0 : i32, i32
  }
  func.func @transform_4(%arg0: i32) -> (i32, i32) {
    %c0_i32 = arith.constant 0 : i32
    %c0_i32_0 = arith.constant 0 : i32
    %c0_i32_1 = arith.constant 0 : i32
    return %c0_i32, %c0_i32_0 : i32, i32
  }
  func.func @transform_5(%arg0: i32) -> (i32, i32) {
    %c0_i32 = arith.constant 0 : i32
    %c0_i32_0 = arith.constant 0 : i32
    %c0_i32_1 = arith.constant 0 : i32
    return %c0_i32, %c0_i32_0 : i32, i32
  }
  func.func @transform_6(%arg0: i32) -> (i32, i32) {
    %c0_i32 = arith.constant 0 : i32
    %c0_i32_0 = arith.constant 0 : i32
    %c0_i32_1 = arith.constant 0 : i32
    return %c0_i32, %c0_i32_0 : i32, i32
  }
  func.func @transform_7(%arg0: i32) -> (i32, i32) {
    %c0_i32 = arith.constant 0 : i32
    %c0_i32_0 = arith.constant 0 : i32
    %c0_i32_1 = arith.constant 0 : i32
    return %c0_i32, %c0_i32_0 : i32, i32
  }
  func.func @transform_8(%arg0: i32) -> (i32, i32) {
    %c0_i32 = arith.constant 0 : i32
    %c0_i32_0 = arith.constant 0 : i32
    %c0_i32_1 = arith.constant 0 : i32
    return %c0_i32, %c0_i32_0 : i32, i32
  }
  func.func @transform_9(%arg0: i32) -> (i32, i32) {
    %c0_i32 = arith.constant 0 : i32
    %c0_i32_0 = arith.constant 0 : i32
    return %arg0, %c0_i32 : i32, i32
  }
  func.func @transform_10(%arg0: i32) -> (i32, i32) {
    %c0_i32 = arith.constant 0 : i32
    %c0_i32_0 = arith.constant 0 : i32
    %c0_i32_1 = arith.constant 0 : i32
    return %c0_i32, %c0_i32_0 : i32, i32
  }
  func.func @transform_11(%arg0: i32) -> (i32, i32) {
    %c0_i32 = arith.constant 0 : i32
    %c0_i32_0 = arith.constant 0 : i32
    return %arg0, %c0_i32 : i32, i32
  }
  func.func @transform_12(%arg0: i32) -> (i32, i32) {
    %c0_i32 = arith.constant 0 : i32
    %c0_i32_0 = arith.constant 0 : i32
    return %arg0, %c0_i32 : i32, i32
  }
  func.func @transform_13(%arg0: i32) -> (i32, i32) {
    %c0_i32 = arith.constant 0 : i32
    %c0_i32_0 = arith.constant 0 : i32
    return %arg0, %c0_i32 : i32, i32
  }
  func.func @transform_14(%arg0: i32) -> (i32, i32) {
    %c0_i32 = arith.constant 0 : i32
    %c0_i32_0 = arith.constant 0 : i32
    return %arg0, %c0_i32 : i32, i32
  }
}

module attributes {stable_mosaic.version = 11 : i64} {
  func.func @_decoder_kernel(%arg0: i32, %arg1: memref<8x16xf32, #tpu.memory_space<vmem>>, %arg2: memref<16x128xf32, #tpu.memory_space<vmem>>, %arg3: memref<1x128xf32, #tpu.memory_space<vmem>>, %arg4: memref<128x256xf32, #tpu.memory_space<vmem>>, %arg5: memref<1x256xf32, #tpu.memory_space<vmem>>, %arg6: memref<128x256xf32, #tpu.memory_space<vmem>>, %arg7: memref<1x256xf32, #tpu.memory_space<vmem>>, %arg8: memref<128x256xf32, #tpu.memory_space<vmem>>, %arg9: memref<1x256xf32, #tpu.memory_space<vmem>>, %arg10: memref<8x1xf32, #tpu.memory_space<vmem>>, %arg11: memref<1x256xf32, #tpu.memory_space<vmem>>, %arg12: memref<8x256xf32, #tpu.memory_space<vmem>>, %arg13: memref<8x256xf32, #tpu.memory_space<vmem>>, %arg14: memref<8x256xf32, #tpu.memory_space<vmem>>, %arg15: memref<8x256xf32, #tpu.memory_space<vmem>>) attributes {dimension_semantics = [#tpu.dimension_semantics<parallel>], iteration_bounds = array<i64: 3>, scalar_prefetch = 0 : i64, scratch_operands = 0 : i64, tpu.core_type = #tpu.core_type<tc>, window_params = [{transform_indices = @transform_0, window_bounds = array<i64: 8, 16>}, {pipeline_mode = #tpu.pipeline_mode<synchronous>, transform_indices = @transform_1, window_bounds = array<i64: 16, 128>}, {pipeline_mode = #tpu.pipeline_mode<synchronous>, transform_indices = @transform_2, window_bounds = array<i64: 1, 128>}, {pipeline_mode = #tpu.pipeline_mode<synchronous>, transform_indices = @transform_3, window_bounds = array<i64: 128, 256>}, {pipeline_mode = #tpu.pipeline_mode<synchronous>, transform_indices = @transform_4, window_bounds = array<i64: 1, 256>}, {pipeline_mode = #tpu.pipeline_mode<synchronous>, transform_indices = @transform_5, window_bounds = array<i64: 128, 256>}, {pipeline_mode = #tpu.pipeline_mode<synchronous>, transform_indices = @transform_6, window_bounds = array<i64: 1, 256>}, {pipeline_mode = #tpu.pipeline_mode<synchronous>, transform_indices = @transform_7, window_bounds = array<i64: 128, 256>}, {pipeline_mode = #tpu.pipeline_mode<synchronous>, transform_indices = @transform_8, window_bounds = array<i64: 1, 256>}, {transform_indices = @transform_9, window_bounds = array<i64: 8, 1>}, {pipeline_mode = #tpu.pipeline_mode<synchronous>, transform_indices = @transform_10, window_bounds = array<i64: 1, 256>}, {transform_indices = @transform_11, window_bounds = array<i64: 8, 256>}, {transform_indices = @transform_12, window_bounds = array<i64: 8, 256>}, {transform_indices = @transform_13, window_bounds = array<i64: 8, 256>}, {transform_indices = @transform_14, window_bounds = array<i64: 8, 256>}]} {
    %c0 = arith.constant 0 : index
    %c0_0 = arith.constant 0 : index
    %0 = vector.load %arg1[%c0, %c0_0] : memref<8x16xf32, #tpu.memory_space<vmem>>, vector<8x16xf32>
    %c0_1 = arith.constant 0 : index
    %c0_2 = arith.constant 0 : index
    %1 = vector.load %arg2[%c0_1, %c0_2] : memref<16x128xf32, #tpu.memory_space<vmem>>, vector<16x128xf32>
    %cst = arith.constant dense<0.000000e+00> : vector<8x128xf32>
    %2 = tpu.matmul %0, %1, %cst {dimension_numbers = #tpu.dot_dimension_numbers<[1], [0], [0], [1], [0, 0, 1, 1], [], []>} : vector<8x16xf32>, vector<16x128xf32>, vector<8x128xf32> -> vector<8x128xf32>
    %c0_3 = arith.constant 0 : index
    %c0_4 = arith.constant 0 : index
    %3 = vector.load %arg3[%c0_3, %c0_4] : memref<1x128xf32, #tpu.memory_space<vmem>>, vector<1x128xf32>
    %4 = vector.broadcast %3 : vector<1x128xf32> to vector<8x128xf32>
    %5 = arith.addf %2, %4 : vector<8x128xf32>
    %cst_5 = arith.constant 0.000000e+00 : f32
    %6 = vector.broadcast %cst_5 : f32 to vector<8x128xf32>
    %7 = arith.maximumf %5, %6 : vector<8x128xf32>
    %c0_6 = arith.constant 0 : index
    %c0_7 = arith.constant 0 : index
    %8 = vector.load %arg6[%c0_6, %c0_7] : memref<128x256xf32, #tpu.memory_space<vmem>>, vector<128x256xf32>
    %cst_8 = arith.constant dense<0.000000e+00> : vector<8x256xf32>
    %9 = tpu.matmul %7, %8, %cst_8 {dimension_numbers = #tpu.dot_dimension_numbers<[1], [0], [0], [1], [0, 0, 1, 1], [], []>} : vector<8x128xf32>, vector<128x256xf32>, vector<8x256xf32> -> vector<8x256xf32>
    %c0_9 = arith.constant 0 : index
    %c0_10 = arith.constant 0 : index
    %10 = vector.load %arg7[%c0_9, %c0_10] : memref<1x256xf32, #tpu.memory_space<vmem>>, vector<1x256xf32>
    %11 = vector.broadcast %10 : vector<1x256xf32> to vector<8x256xf32>
    %12 = arith.addf %9, %11 : vector<8x256xf32>
    %c0_11 = arith.constant 0 : index
    %c0_12 = arith.constant 0 : index
    %13 = vector.load %arg15[%c0_11, %c0_12] : memref<8x256xf32, #tpu.memory_space<vmem>>, vector<8x256xf32>
    tpu.vector_store %arg15[%c0_11, %c0_12], %12 {strides = array<i32>} : memref<8x256xf32, #tpu.memory_space<vmem>>, vector<8x256xf32>,
    %c0_13 = arith.constant 0 : index
    %c0_14 = arith.constant 0 : index
    %14 = vector.load %arg8[%c0_13, %c0_14] : memref<128x256xf32, #tpu.memory_space<vmem>>, vector<128x256xf32>
    %cst_15 = arith.constant dense<0.000000e+00> : vector<8x256xf32>
    %15 = tpu.matmul %7, %14, %cst_15 {dimension_numbers = #tpu.dot_dimension_numbers<[1], [0], [0], [1], [0, 0, 1, 1], [], []>} : vector<8x128xf32>, vector<128x256xf32>, vector<8x256xf32> -> vector<8x256xf32>
    %c0_16 = arith.constant 0 : index
    %c0_17 = arith.constant 0 : index
    %16 = vector.load %arg9[%c0_16, %c0_17] : memref<1x256xf32, #tpu.memory_space<vmem>>, vector<1x256xf32>
    %17 = vector.broadcast %16 : vector<1x256xf32> to vector<8x256xf32>
    %18 = arith.addf %15, %17 : vector<8x256xf32>
    %cst_18 = arith.constant -3.000000e+00 : f32
    %cst_19 = arith.constant 3.000000e+00 : f32
    %19 = vector.broadcast %cst_18 : f32 to vector<8x256xf32>
    %20 = arith.maximumf %19, %18 : vector<8x256xf32>
    %21 = vector.broadcast %cst_19 : f32 to vector<8x256xf32>
    %22 = arith.minimumf %21, %20 : vector<8x256xf32>
    %c0_20 = arith.constant 0 : index
    %c0_21 = arith.constant 0 : index
    %23 = vector.load %arg13[%c0_20, %c0_21] : memref<8x256xf32, #tpu.memory_space<vmem>>, vector<8x256xf32>
    tpu.vector_store %arg13[%c0_20, %c0_21], %22 {strides = array<i32>} : memref<8x256xf32, #tpu.memory_space<vmem>>, vector<8x256xf32>,
    %c0_22 = arith.constant 0 : index
    %c0_23 = arith.constant 0 : index
    %24 = vector.load %arg4[%c0_22, %c0_23] : memref<128x256xf32, #tpu.memory_space<vmem>>, vector<128x256xf32>
    %cst_24 = arith.constant dense<0.000000e+00> : vector<8x256xf32>
    %25 = tpu.matmul %7, %24, %cst_24 {dimension_numbers = #tpu.dot_dimension_numbers<[1], [0], [0], [1], [0, 0, 1, 1], [], []>} : vector<8x128xf32>, vector<128x256xf32>, vector<8x256xf32> -> vector<8x256xf32>
    %c0_25 = arith.constant 0 : index
    %c0_26 = arith.constant 0 : index
    %26 = vector.load %arg5[%c0_25, %c0_26] : memref<1x256xf32, #tpu.memory_space<vmem>>, vector<1x256xf32>
    %27 = vector.broadcast %26 : vector<1x256xf32> to vector<8x256xf32>
    %28 = arith.addf %25, %27 : vector<8x256xf32>
    %cst_27 = arith.constant dense<0xFF800000> : vector<8xf32>
    %29 = vector.multi_reduction <maximumf>, %28, %cst_27 [1] : vector<8x256xf32> to vector<8xf32>
    %30 = vector.shape_cast %29 : vector<8xf32> to vector<8x1xf32>
    %31 = vector.broadcast %30 : vector<8x1xf32> to vector<8x256xf32>
    %32 = arith.subf %28, %31 : vector<8x256xf32>
    %33 = math.exp %32 : vector<8x256xf32>
    %cst_28 = arith.constant dense<0.000000e+00> : vector<8xf32>
    %34 = vector.multi_reduction <add>, %33, %cst_28 [1] : vector<8x256xf32> to vector<8xf32>
    %35 = vector.shape_cast %34 : vector<8xf32> to vector<8x1xf32>
    %36 = tpu.reciprocal %35 : vector<8x1xf32> -> vector<8x1xf32>
    %37 = vector.broadcast %36 : vector<8x1xf32> to vector<8x256xf32>
    %38 = arith.mulf %33, %37 : vector<8x256xf32>
    %c0_29 = arith.constant 0 : index
    %c0_30 = arith.constant 0 : index
    %39 = vector.load %arg12[%c0_29, %c0_30] : memref<8x256xf32, #tpu.memory_space<vmem>>, vector<8x256xf32>
    tpu.vector_store %arg12[%c0_29, %c0_30], %38 {strides = array<i32>} : memref<8x256xf32, #tpu.memory_space<vmem>>, vector<8x256xf32>,
    %c0_31 = arith.constant 0 : index
    %c0_32 = arith.constant 0 : index
    %40 = vector.load %arg10[%c0_31, %c0_32] : memref<8x1xf32, #tpu.memory_space<vmem>>, vector<8x1xf32>
    %41 = vector.broadcast %40 : vector<8x1xf32> to vector<8x256xf32>
    %42 = arith.mulf %41, %38 : vector<8x256xf32>
    %c0_33 = arith.constant 0 : index
    %c0_34 = arith.constant 0 : index
    %43 = vector.load %arg11[%c0_33, %c0_34] : memref<1x256xf32, #tpu.memory_space<vmem>>, vector<1x256xf32>
    %44 = vector.broadcast %43 : vector<1x256xf32> to vector<8x256xf32>
    %45 = arith.mulf %42, %44 : vector<8x256xf32>
    %c0_35 = arith.constant 0 : index
    %c0_36 = arith.constant 0 : index
    %46 = vector.load %arg14[%c0_35, %c0_36] : memref<8x256xf32, #tpu.memory_space<vmem>>, vector<8x256xf32>
    tpu.vector_store %arg14[%c0_35, %c0_36], %45 {strides = array<i32>} : memref<8x256xf32, #tpu.memory_space<vmem>>, vector<8x256xf32>,
    return
  }
  func.func @transform_0(%arg0: i32) -> (i32, i32) {
    %c0_i32 = arith.constant 0 : i32
    %c0_i32_0 = arith.constant 0 : i32
    return %arg0, %c0_i32 : i32, i32
  }
  func.func @transform_1(%arg0: i32) -> (i32, i32) {
    %c0_i32 = arith.constant 0 : i32
    %c0_i32_0 = arith.constant 0 : i32
    %c0_i32_1 = arith.constant 0 : i32
    return %c0_i32, %c0_i32_0 : i32, i32
  }
  func.func @transform_2(%arg0: i32) -> (i32, i32) {
    %c0_i32 = arith.constant 0 : i32
    %c0_i32_0 = arith.constant 0 : i32
    %c0_i32_1 = arith.constant 0 : i32
    return %c0_i32, %c0_i32_0 : i32, i32
  }
  func.func @transform_3(%arg0: i32) -> (i32, i32) {
    %c0_i32 = arith.constant 0 : i32
    %c0_i32_0 = arith.constant 0 : i32
    %c0_i32_1 = arith.constant 0 : i32
    return %c0_i32, %c0_i32_0 : i32, i32
  }
  func.func @transform_4(%arg0: i32) -> (i32, i32) {
    %c0_i32 = arith.constant 0 : i32
    %c0_i32_0 = arith.constant 0 : i32
    %c0_i32_1 = arith.constant 0 : i32
    return %c0_i32, %c0_i32_0 : i32, i32
  }
  func.func @transform_5(%arg0: i32) -> (i32, i32) {
    %c0_i32 = arith.constant 0 : i32
    %c0_i32_0 = arith.constant 0 : i32
    %c0_i32_1 = arith.constant 0 : i32
    return %c0_i32, %c0_i32_0 : i32, i32
  }
  func.func @transform_6(%arg0: i32) -> (i32, i32) {
    %c0_i32 = arith.constant 0 : i32
    %c0_i32_0 = arith.constant 0 : i32
    %c0_i32_1 = arith.constant 0 : i32
    return %c0_i32, %c0_i32_0 : i32, i32
  }
  func.func @transform_7(%arg0: i32) -> (i32, i32) {
    %c0_i32 = arith.constant 0 : i32
    %c0_i32_0 = arith.constant 0 : i32
    %c0_i32_1 = arith.constant 0 : i32
    return %c0_i32, %c0_i32_0 : i32, i32
  }
  func.func @transform_8(%arg0: i32) -> (i32, i32) {
    %c0_i32 = arith.constant 0 : i32
    %c0_i32_0 = arith.constant 0 : i32
    %c0_i32_1 = arith.constant 0 : i32
    return %c0_i32, %c0_i32_0 : i32, i32
  }
  func.func @transform_9(%arg0: i32) -> (i32, i32) {
    %c0_i32 = arith.constant 0 : i32
    %c0_i32_0 = arith.constant 0 : i32
    return %arg0, %c0_i32 : i32, i32
  }
  func.func @transform_10(%arg0: i32) -> (i32, i32) {
    %c0_i32 = arith.constant 0 : i32
    %c0_i32_0 = arith.constant 0 : i32
    %c0_i32_1 = arith.constant 0 : i32
    return %c0_i32, %c0_i32_0 : i32, i32
  }
  func.func @transform_11(%arg0: i32) -> (i32, i32) {
    %c0_i32 = arith.constant 0 : i32
    %c0_i32_0 = arith.constant 0 : i32
    return %arg0, %c0_i32 : i32, i32
  }
  func.func @transform_12(%arg0: i32) -> (i32, i32) {
    %c0_i32 = arith.constant 0 : i32
    %c0_i32_0 = arith.constant 0 : i32
    return %arg0, %c0_i32 : i32, i32
  }
  func.func @transform_13(%arg0: i32) -> (i32, i32) {
    %c0_i32 = arith.constant 0 : i32
    %c0_i32_0 = arith.constant 0 : i32
    return %arg0, %c0_i32 : i32, i32
  }
  func.func @transform_14(%arg0: i32) -> (i32, i32) {
    %c0_i32 = arith.constant 0 : i32
    %c0_i32_0 = arith.constant 0 : i32
    return %arg0, %c0_i32 : i32, i32
  }
}

</mosaic_0001>

<bundles_post_ra>
// kernel: tpu_custom_call.1
= control target key start
LH: loop header
LB: loop body
LE: loop exit
PB: predicated region body
PF: predicated region fallthrough
CT: control target
= control target key end

     0   :  { %s2063_s0 = inlined_call_operand.vmem [shape: f32[24,16], index: 0, kind: input, shape index: {}]   ;;  %s2064_s1 = inlined_call_operand.vmem [shape: f32[16,128], index: 1, kind: input, shape index: {}]   ;;  %s2065_s2 = inlined_call_operand.vmem [shape: f32[1,128], index: 2, kind: input, shape index: {}]   ;;  %s2066_s3 = inlined_call_operand.hbm [shape: f32[128,256], index: 3, kind: input, shape index: {}]   ;;  %s2067_s4 = inlined_call_operand.vmem [shape: f32[1,256], index: 4, kind: input, shape index: {}]   ;;  %s2068_s5 = inlined_call_operand.hbm [shape: f32[128,256], index: 5, kind: input, shape index: {}]   ;;  %s2069_s6 = inlined_call_operand.vmem [shape: f32[1,256], index: 6, kind: input, shape index: {}]   ;;  %s2070_s7 = inlined_call_operand.hbm [shape: f32[128,256], index: 7, kind: input, shape index: {}]   ;;  %s2071_s8 = inlined_call_operand.vmem [shape: f32[1,256], index: 8, kind: input, shape index: {}]   ;;  %s2072_s9 = inlined_call_operand.vmem [shape: f32[24,1], index: 9, kind: input, shape index: {}]   ;;  %s2073_s10 = inlined_call_operand.vmem [shape: f32[1,256], index: 10, kind: input, shape index: {}]   ;;  %s2074_s11 = inlined_call_operand.hbm [shape: f32[24,256], index: 11, kind: output, shape index: {0}]   ;;  %s2075_s12 = inlined_call_operand.hbm [shape: f32[24,256], index: 12, kind: output, shape index: {1}]   ;;  %s2076_s13 = inlined_call_operand.hbm [shape: f32[24,256], index: 13, kind: output, shape index: {2}]   ;;  %s2077_s14 = inlined_call_operand.hbm [shape: f32[24,256], index: 14, kind: output, shape index: {3}]  }
   0x1   :  { %2086 = sst [smem:[#allocation24_spill]] %s2063_s0 }
   0x2   :  { %2087 = sst [smem:[#allocation25_spill]] %s2064_s1 }
   0x3   :  { %2088 = sst [smem:[#allocation26_spill]] %s2065_s2 }
   0x4   :  { %2089 = sst [smem:[#allocation27_spill]] %s2066_s3 }
   0x5   :  { %20 = vsyncpa [#allocation3], 0 }
   0x6   :  { %21 = vsyncpa [#allocation6], 0 }
   0x7   :  { %22 = vsyncpa [#allocation4], 0 }
   0x8   :  { %24 = vsyncpa [#allocation4 + $0x1], 0 }
   0x9   :  { %25 = vsyncpa [#allocation10], 0 }
   0xa   :  { %27 = vsyncpa [#allocation10 + $0x1], 0 }
   0xb   :  { %28 = vsyncpa [#allocation13], 0 }
   0xc   :  { %30 = vsyncpa [#allocation13 + $0x1], 0  ;;  %s1765_s29 = smov 0   ;;  %s1767_s30 = smov 0  }
   0xd   :  { %s1769_s15 = smov 0   ;;  %s1771_s16 = smov 0  }
   0xe LB: > { %2090 = sst [smem:[#allocation19_spill]] %s1664_s29  ;;  %s1786_s17 = sadd.s32 4294967295, %s1676_s16   ;;  %s1676_s16 = sphi %s1771_s16, %s2112_s16   ;;  %s1672_s15 = sphi %s1769_s15, %s2114_s15   ;;  %s1668_s30 = sphi %s1767_s30, %s2116_s30   ;;  %s1664_s29 = sphi %s1765_s29, %s2115_s29  }
   0xf   : > { %2091 = sst [smem:[#allocation20_spill]] %s1672_s15  ;;  %s2078_s18 = sadd.s32 4294967294, %s1676_s16  }
  0x10   : > { %s1790_s19 = sadd.s32 1, %s1676_s16   ;;  %s284_s20 = sadd.s32 1, %s1672_s15 }
  0x11   : > { %2092 = sst [smem:[#allocation21_spill]] %s1790_s19  ;;  %s281_s21 = ssub.s32 %s1676_s16, %s1790_s19 }
  0x12   : > { %p294_p0 = scmp.ne.s32.totalorder %s1672_s15, %s1668_s30  ;;  %p282_p1 = scmp.eq.s32.totalorder %s281_s21, 0 }
  0x13   : > { %p295_p2 = scmp.eq.s32.totalorder %s1786_s17, 2  ;;  %p300_p3 = scmp.ne.s32.totalorder %s1668_s30, %s1664_s29 }
  0x14   : > { %p301_p4 = scmp.eq.s32.totalorder %s2078_s18, 2  ;;  %p1299_p7 = scmp.ge.s32.totalorder %s1676_s16, 1 }
  0x15   : > { %s1803_s22 = scalar_select %p282_p1, %s1672_s15, %s284_s20  }
  0x16   : > { %p1805_p5 = por %p295_p2, %p294_p0  ;;  %p1809_p6 = por %p301_p4, %p300_p3 }
  0x17   : > { %2093 = sst [smem:[#allocation22_spill]] %s1803_s22  ;;  %p386_p8 = scmp.lt.s32.totalorder %s1676_s16, 4 }
  0x18   : > { %s2094_s23 = scalar_select %p1805_p5, 1, 0 }
  0x19   : > { %s2095_s24 = scalar_select %p1809_p6, 1, 0 }
  0x1a   : > { %p2083_p9 = scmp.eq.s32.totalorder %s1786_s17, 0  ;;  %p1816_p10 = pnand %p1299_p7, %p386_p8 }
  0x1b   : > { %2096 = sst [smem:[#allocation23_spill]] %s2095_s24  ;;  %s1678_s26 = smov [#allocation5]  }
  0x1c   : > { %p1366_p11 = pneg %p1816_p10  ;;  %s420_s27 = sshll.u32 %s1678_s26, 4  ;;  %s421_s27 = int_to_ptr.vmem [resolvable:$true] %s420_s27 }
  0x1d   : > { %s1679_s20 = smov [#allocation2]   ;;  %s1680_s18 = smov [#allocation7]  }
  0x1e   : > { %p1824_p12 = pnand %p2083_p9, %p1366_p11  ;;  %s404_s21 = sshll.u32 %s1679_s20, 4  ;;  %s405_s21 = int_to_ptr.vmem [resolvable:$true] %s404_s21 }
  0x1f   : > { %s436_s22 = sshll.u32 %s1680_s18, 4  ;;  %s1455_s15 = scalar_lea.vmem %s421_s27, 4096  ;;  %s437_s22 = int_to_ptr.vmem [resolvable:$true] %s436_s22 }
  0x20   : > { %p1446_p13 = pneg %p1824_p12  ;;  %p1456_p0 = scmp.ne.s32.totalorder %s421_s27, %s1455_s15 }
  0x21   : > { %p1463_p3 = scmp.lt.s32.totalorder %s421_s27, %s421_s27  ;;  %p1464_p4 = scmp.lt.s32.totalorder %s1455_s15, %s1455_s15 }
  0x22   : > { %p1458_p1 = pnand %p1456_p0, %p1446_p13 }
  0x23   : > { %p1465_p7 = por %p1464_p4, %p1463_p3 }
  0x24   : > { %p1459_p2 = pneg %p1458_p1 }
  0x26   : > { %p1466_p8 = pnand %p1465_p7, %p1459_p2 }
  0x28   : > { %1469 = shalt.err (!%p1466_p8)
}
  0x29   : > { %s1681_s26 = smov 256   ;;  %s1682_s20 = smov 16  }
  0x2a   : > { %1372 = dma.hbm_to_vmem [thread:$0]  (!%p1824_p12), %s2068_s5, 4096, %s421_s27, [#allocation6], %s1681_s26, %s1681_s26, %s1682_s20  }
  0x2b   : > { %s1481_s24 = scalar_lea.vmem %s405_s21, 4096  ;;  %p1489_p9 = scmp.lt.s32.totalorder %s405_s21, %s405_s21 }
  0x2c   : > { %p1482_p11 = scmp.ne.s32.totalorder %s405_s21, %s1481_s24  ;;  %p1490_p6 = scmp.lt.s32.totalorder %s1481_s24, %s1481_s24 }
  0x2e   : > { %p1484_p0 = pnand %p1482_p11, %p1446_p13  ;;  %p1491_p3 = por %p1490_p6, %p1489_p9 }
  0x30   : > { %p1485_p1 = pneg %p1484_p0 }
  0x32   : > { %p1492_p2 = pnand %p1491_p3, %p1485_p1 }
  0x34   : > { %1495 = shalt.err (!%p1492_p2)
}
  0x35   : > { %s2099_s3 = sld [smem:[#allocation27_spill]]  ;;  %s1507_s19 = scalar_lea.vmem %s437_s22, 4096 }
  0x36   : > { %p1508_p4 = scmp.ne.s32.totalorder %s437_s22, %s1507_s19  ;;  %p1515_p11 = scmp.lt.s32.totalorder %s437_s22, %s437_s22 }
  0x37   : > { %p1516_p0 = scmp.lt.s32.totalorder %s1507_s19, %s1507_s19 }
  0x38   : > { %p1510_p7 = pnand %p1508_p4, %p1446_p13 }
  0x39   : > { %p1517_p5 = por %p1516_p0, %p1515_p11 }
  0x3a   : > { %p1511_p8 = pneg %p1510_p7 }
  0x3b   : > { %1369 = dma.hbm_to_vmem [thread:$0]  (!%p1824_p12), %s2099_s3, 4096, %s405_s21, [#allocation3], %s1681_s26, %s1681_s26, %s1682_s20  }
  0x3c   : > { %p1518_p6 = pnand %p1517_p5, %p1511_p8 }
  0x3e   : > { %1521 = shalt.err (!%p1518_p6)
}
  0x3f   : > { %1375 = dma.hbm_to_vmem [thread:$0]  (!%p1824_p12), %s2070_s7, 4096, %s437_s22, [#allocation6], %s1681_s26, %s1681_s26, %s1682_s20  }
  0x40   : > { %472 = sbr.rel (%p1816_p10) target bundleno = 860 (0x35c), region = 64  ;;  %p2100_p9 = scmp.eq.s32.totalorder (!%p1816_p10), %s1786_s17, 0 }
  0x45   : > { %1643 = dma.done.wait (%p2100_p9), [#allocation3], 4096   ;;  %p2101_p13 = pmov %p2100_p9 }
  0x46   : > { %p2102_p1 = pmov %p2100_p9 }
  0x47   : > { %1645 = vsyncadd (%p2101_p13), [#allocation3], 4294963200 }
  0x48   : > { %1647 = dma.done.wait (%p2102_p1), [#allocation6], 8192   ;;  %p2103_p5 = pmov %p2102_p1 }
  0x49   : > { %p544_p3 = scmp.lt.s32.totalorder %s1786_s17, 2  ;;  %v1683_v0 = vmov 0.0   ;;  %vm1684_vm0 = vmmov 0   ;;  %s2104_s0 = sld [smem:[#allocation24_spill]]  ;;  %vm562_vm1 = vcmask 130048   ;;  %v668_v4 = vld [vmem:[#allocation5 + $0xf8] sm:$0xff] }
  0x4a   : > { %1649 = vsyncadd (%p2103_p5), [#allocation6], 4294959104  ;;  %1339 = vmatprep.subr.mxu0 %v1683_v0  ;;  %1343 = vmatprep.mubr.msk.f32.mxu0 %vm1684_vm0, %v1683_v0  ;;  %s2105_s1 = sld [smem:[#allocation25_spill]]  ;;  %v667_v5 = vld [vmem:[#allocation5 + $0xf0] sm:$0xff]  ;;  %v785_v6 = vld [vmem:[#allocation7 + $0xf8] sm:$0xff]  ;;  %s1897_s27 = sand.u32 1, %s1668_s30  }
  0x4b   : > { %s1868_s29 = scalar_select %p544_p3, %s1786_s17, 2  ;;  %745 = vmatprep.mubr.f32.mxu1 %v1683_v0  ;;  %681 = vmatprep.subr.mxu1 %v668_v4  ;;  %v666_v7 = vld [vmem:[#allocation5 + $0xe8] sm:$0xff]  ;;  %v784_v8 = vld [vmem:[#allocation7 + $0xf0] sm:$0xff]  ;;  %v665_v9 = vld [vmem:[#allocation5 + $0xe0] sm:$0xff] }
  0x4c   : > { %682 = vmatpush1.msra.mxu1 %v667_v5  ;;  %v783_v10 = vld [vmem:[#allocation7 + $0xe8] sm:$0xff]  ;;  %v664_v11 = vld [vmem:[#allocation5 + $0xd8] sm:$0xff]  ;;  %v782_v12 = vld [vmem:[#allocation7 + $0xe0] sm:$0xff]  ;;  %s2106_s2 = sld [smem:[#allocation26_spill]]  ;;  %s1908_s20 = sshll.u32 %s1897_s27, 4 }
  0x4d   : > { %s1312_s22 = sshll.u32 %s1868_s29, 3  ;;  %683 = vmatprep.subr.mxu1 %v666_v7  ;;  %v663_v13 = vld [vmem:[#allocation5 + $0xd0] sm:$0xff]  ;;  %v781_v14 = vld [vmem:[#allocation7 + $0xd8] sm:$0xff]  ;;  %v662_v15 = vld [vmem:[#allocation5 + $0xc8] sm:$0xff]  ;;  %s1915_s18 = scalar_lea.vmem [#allocation12], %s1908_s20 }
  0x4e   : > { %684 = vmatpush1.msra.mxu1 %v665_v9  ;;  %v780_v16 = vld [vmem:[#allocation7 + $0xd0] sm:$0xff]  ;;  %v661_v17 = vld [vmem:[#allocation5 + $0xc0] sm:$0xff]  ;;  %v779_v18 = vld [vmem:[#allocation7 + $0xc8] sm:$0xff]  ;;  %s1919_s15 = scalar_lea.vmem [#allocation9], %s1908_s20  ;;  %s1036_s29 = sand.u32 1, %s1786_s17  }
  0x4f   : > { %s547_s21 = scalar_lea.vmem %s2104_s0, %s1312_s22  ;;  %685 = vmatprep.subr.mxu1 %v664_v11  ;;  %v660_v19 = vld [vmem:[#allocation5 + $0xb8] sm:$0xff]  ;;  %v778_v20 = vld [vmem:[#allocation7 + $0xc0] sm:$0xff]  ;;  %v659_v21 = vld [vmem:[#allocation5 + $0xb0] sm:$0xff]  ;;  %s1075_s25 = sshll.u32 %s1919_s15, 4  ;;  %s1076_s25 = int_to_ptr.vmem [resolvable:$true] %s1075_s25 }
  0x50   : > { %v554_v1 = vld [vmem:[%s2105_s1 + $0x8] sm:$0xff]  ;;  %v553_v2 = vld [vmem:[%s2105_s1] sm:$0xff]  ;;  %686 = vmatpush1.msra.mxu1 %v663_v13  ;;  %v777_v22 = vld [vmem:[#allocation7 + $0xb8] sm:$0xff]  ;;  %s1949_s28 = scalar_lea.sflag [#allocation10], %s1036_s29  ;;  %p2107_p12 = scmp.ne.s32.totalorder %s2094_s23, 0 }
  0x51   : > { %v552_v3 = vld [vmem:[%s547_s21] sm:$0xff]  ;;  %1340 = vmatpush3.msra.mxu0 %v554_v1  ;;  %687 = vmatprep.subr.mxu1 %v662_v15  ;;  %v658_v23 = vld [vmem:[#allocation5 + $0xa8] sm:$0xff]  ;;  %v776_v24 = vld [vmem:[#allocation7 + $0xb0] sm:$0xff]  ;;  %s551_s21 = scalar_lea.vmem %s2072_s9, %s1312_s22  ;;  %s1942_s22 = sshll.u32 %s1786_s17, 8 }
  0x52   : > { %1341 = vmatprep.subr.mxu0 %v1683_v0  ;;  %688 = vmatpush1.msra.mxu1 %v661_v17  ;;  %v657_v25 = vld [vmem:[#allocation5 + $0xa0] sm:$0xff]  ;;  %v775_v26 = vld [vmem:[#allocation7 + $0xa8] sm:$0xff]  ;;  %v656_v27 = vld [vmem:[#allocation5 + $0x98] sm:$0xff]  ;;  %s1073_s24 = scalar_lea.hbm %s2075_s12, %s1942_s22  ;;  %s1686_s0 = smov [#allocation9]  }
  0x53   : > { %1342 = vmatpush3.msra.mxu0 %v553_v2  ;;  %689 = vmatprep.subr.mxu1 %v660_v19  ;;  %v774_v28 = vld [vmem:[#allocation7 + $0xa0] sm:$0xff]  ;;  %v655_v29 = vld [vmem:[#allocation5 + $0x90] sm:$0xff]  ;;  %v773_v30 = vld [vmem:[#allocation7 + $0x98] sm:$0xff]  ;;  %s1526_s1 = sshll.u32 %s1686_s0, 4  ;;  %s1527_s1 = int_to_ptr.vmem [resolvable:$false] %s1526_s1 }
  0x54   : > { %1344 = vmatmul.mubr.msk.f32.vlgmr.msra.gmra.mxu0 %vm562_vm1, %v552_v3  ;;  %798 = vmatprep.subr.mxu0 %v785_v6  ;;  %v654_v31 = vld [vmem:[#allocation5 + $0x88] sm:$0xff]  ;;  %v772_v32 = vld [vmem:[#allocation7 + $0x90] sm:$0xff]  ;;  %v653_v33 = vld [vmem:[#allocation5 + $0x80] sm:$0xff]  ;;  %p1529_p7 = scmp.lt.s32.totalorder %s1076_s25, %s1527_s1 }
  0x55   : > { %799 = vmatpush1.msra.mxu0 %v784_v8  ;;  %690 = vmatpush1.msra.mxu1 %v659_v21  ;;  %v771_v34 = vld [vmem:[#allocation7 + $0x88] sm:$0xff]  ;;  %v652_v35 = vld [vmem:[#allocation5 + $0x78] sm:$0xff]  ;;  %v770_v36 = vld [vmem:[#allocation7 + $0x80] sm:$0xff] }
  0x56   : > { %800 = vmatprep.subr.mxu0 %v783_v10  ;;  %691 = vmatprep.subr.mxu1 %v658_v23  ;;  %v651_v37 = vld [vmem:[#allocation5 + $0x70] sm:$0xff]  ;;  %v769_v38 = vld [vmem:[#allocation7 + $0x78] sm:$0xff]  ;;  %v650_v39 = vld [vmem:[#allocation5 + $0x68] sm:$0xff] }
  0x57   : > { %801 = vmatpush1.msra.mxu0 %v782_v12  ;;  %692 = vmatpush1.msra.mxu1 %v657_v25  ;;  %v768_v40 = vld [vmem:[#allocation7 + $0x70] sm:$0xff]  ;;  %v649_v41 = vld [vmem:[#allocation5 + $0x60] sm:$0xff]  ;;  %v767_v42 = vld [vmem:[#allocation7 + $0x68] sm:$0xff] }
  0x58   : > { %802 = vmatprep.subr.mxu0 %v781_v14  ;;  %693 = vmatprep.subr.mxu1 %v656_v27  ;;  %v648_v43 = vld [vmem:[#allocation5 + $0x58] sm:$0xff]  ;;  %v766_v44 = vld [vmem:[#allocation7 + $0x60] sm:$0xff]  ;;  %v647_v45 = vld [vmem:[#allocation5 + $0x50] sm:$0xff] }
  0x59   : > { %803 = vmatpush1.msra.mxu0 %v780_v16  ;;  %694 = vmatpush1.msra.mxu1 %v655_v29  ;;  %v765_v46 = vld [vmem:[#allocation7 + $0x58] sm:$0xff]  ;;  %v646_v47 = vld [vmem:[#allocation5 + $0x48] sm:$0xff]  ;;  %v764_v48 = vld [vmem:[#allocation7 + $0x50] sm:$0xff] }
  0x5a   : > { %804 = vmatprep.subr.mxu0 %v779_v18  ;;  %695 = vmatprep.subr.mxu1 %v654_v31  ;;  %v645_v49 = vld [vmem:[#allocation5 + $0x40] sm:$0xff]  ;;  %v763_v50 = vld [vmem:[#allocation7 + $0x48] sm:$0xff]  ;;  %v644_v51 = vld [vmem:[#allocation5 + $0x38] sm:$0xff] }
  0x5b   : > { %805 = vmatpush1.msra.mxu0 %v778_v20  ;;  %696 = vmatpush1.msra.mxu1 %v653_v33  ;;  %v762_v52 = vld [vmem:[#allocation7 + $0x40] sm:$0xff]  ;;  %v643_v53 = vld [vmem:[#allocation5 + $0x30] sm:$0xff]  ;;  %v761_v54 = vld [vmem:[#allocation7 + $0x38] sm:$0xff] }
  0x5c   : > { %806 = vmatprep.subr.mxu0 %v777_v22  ;;  %697 = vmatprep.subr.mxu1 %v652_v35  ;;  %v642_v55 = vld [vmem:[#allocation5 + $0x28] sm:$0xff]  ;;  %v760_v56 = vld [vmem:[#allocation7 + $0x30] sm:$0xff]  ;;  %v641_v57 = vld [vmem:[#allocation5 + $0x20] sm:$0xff] }
  0x5d   : > { %807 = vmatpush1.msra.mxu0 %v776_v24  ;;  %698 = vmatpush1.msra.mxu1 %v651_v37  ;;  %v759_v58 = vld [vmem:[#allocation7 + $0x28] sm:$0xff]  ;;  %v640_v59 = vld [vmem:[#allocation5 + $0x18] sm:$0xff]  ;;  %v758_v60 = vld [vmem:[#allocation7 + $0x20] sm:$0xff] }
  0x5e   : > { %808 = vmatprep.subr.mxu0 %v775_v26  ;;  %699 = vmatprep.subr.mxu1 %v650_v39  ;;  %v639_v61 = vld [vmem:[#allocation5 + $0x10] sm:$0xff]  ;;  %v757_v62 = vld [vmem:[#allocation7 + $0x18] sm:$0xff]  ;;  %v638_v63 = vld [vmem:[#allocation5 + $0x8] sm:$0xff] }
  0x5f   : > { %809 = vmatpush1.msra.mxu0 %v774_v28  ;;  %700 = vmatpush1.msra.mxu1 %v649_v41  ;;  %v756_v1 = vld [vmem:[#allocation7 + $0x10] sm:$0xff]  ;;  %v637_v2 = vld [vmem:[#allocation5] sm:$0xff]  ;;  %v755_v3 = vld [vmem:[#allocation7 + $0x8] sm:$0xff]  ;;  %v671_v41 = vlaneseq }
  0x60   : > { %810 = vmatprep.subr.mxu0 %v773_v30  ;;  %701 = vmatprep.subr.mxu1 %v648_v43  ;;  %v754_v4 = vld [vmem:[#allocation7] sm:$0xff]  ;;  %v906_v5 = vld [vmem:[#allocation2 + $0xf8] sm:$0xff]  ;;  %v905_v11 = vld [vmem:[#allocation2 + $0xf0] sm:$0xff] }
  0x61   : > { %811 = vmatpush1.msra.mxu0 %v772_v32  ;;  %702 = vmatpush1.msra.mxu1 %v647_v45  ;;  %v1314_v6 = vld [vmem:[%s2106_s2] ss:$0 sm:$0xff]  ;;  %v904_v12 = vld [vmem:[#allocation2 + $0xe8] sm:$0xff]  ;;  %v902_v14 = vld [vmem:[#allocation2 + $0xd8] sm:$0xff]  ;;  %s1528_s2 = scalar_lea.vmem %s1527_s1, 512 }
  0x62   : > { %812 = vmatprep.subr.mxu0 %v771_v34  ;;  %703 = vmatprep.subr.mxu1 %v646_v47  ;;  %v903_v13 = vld [vmem:[#allocation2 + $0xe0] sm:$0xff]  ;;  %v901_v15 = vld [vmem:[#allocation2 + $0xd0] sm:$0xff]  ;;  %v900_v16 = vld [vmem:[#allocation2 + $0xc8] sm:$0xff] }
  0x63   : > { %813 = vmatpush1.msra.mxu0 %v770_v36  ;;  %704 = vmatpush1.msra.mxu1 %v645_v49  ;;  %v899_v17 = vld [vmem:[#allocation2 + $0xc0] sm:$0xff]  ;;  %v898_v18 = vld [vmem:[#allocation2 + $0xb8] sm:$0xff]  ;;  %v897_v19 = vld [vmem:[#allocation2 + $0xb0] sm:$0xff] }
  0x64   : > { %814 = vmatprep.subr.mxu0 %v769_v38  ;;  %705 = vmatprep.subr.mxu1 %v644_v51  ;;  %v896_v20 = vld [vmem:[#allocation2 + $0xa8] sm:$0xff]  ;;  %v895_v21 = vld [vmem:[#allocation2 + $0xa0] sm:$0xff]  ;;  %v894_v22 = vld [vmem:[#allocation2 + $0x98] sm:$0xff] }
  0x65   : > { %815 = vmatpush1.msra.mxu0 %v768_v40  ;;  %706 = vmatpush1.msra.mxu1 %v643_v53  ;;  %v893_v23 = vld [vmem:[#allocation2 + $0x90] sm:$0xff]  ;;  %v891_v24 = vld [vmem:[#allocation2 + $0x80] sm:$0xff]  ;;  %v890_v25 = vld [vmem:[#allocation2 + $0x78] sm:$0xff] }
  0x66   : > { %816 = vmatprep.subr.mxu0 %v767_v42  ;;  %707 = vmatprep.subr.mxu1 %v642_v55  ;;  %v889_v26 = vld [vmem:[#allocation2 + $0x70] sm:$0xff]  ;;  %v888_v27 = vld [vmem:[#allocation2 + $0x68] sm:$0xff]  ;;  %v887_v28 = vld [vmem:[#allocation2 + $0x60] sm:$0xff]  ;;  %v672_v42 = vshrl.u32 %v671_v41, 7 }
  0x67   : > { %817 = vmatpush1.msra.mxu0 %v766_v44  ;;  %708 = vmatpush1.msra.mxu1 %v641_v57  ;;  %v886_v29 = vld [vmem:[#allocation2 + $0x58] sm:$0xff]  ;;  %v885_v30 = vld [vmem:[#allocation2 + $0x50] sm:$0xff]  ;;  %v884_v31 = vld [vmem:[#allocation2 + $0x48] sm:$0xff] }
  0x68   : > { %818 = vmatprep.subr.mxu0 %v765_v46  ;;  %862 = vmatprep.mubr.f32.mxu0 %v1683_v0  ;;  %v883_v32 = vld [vmem:[#allocation2 + $0x40] sm:$0xff]  ;;  %v882_v33 = vld [vmem:[#allocation2 + $0x38] sm:$0xff]  ;;  %v881_v34 = vld [vmem:[#allocation2 + $0x30] sm:$0xff]  ;;  %v1894_v43 = vsub.s32 0, %v672_v42  ;;  %v1905_v46 = vsub.s32 1, %v672_v42 }
  0x69   : > { %819 = vmatpush1.msra.mxu0 %v764_v48  ;;  %709 = vmatprep.subr.mxu1 %v640_v59  ;;  %v880_v35 = vld [vmem:[#allocation2 + $0x28] sm:$0xff]  ;;  %v879_v36 = vld [vmem:[#allocation2 + $0x20] sm:$0xff]  ;;  %v878_v37 = vld [vmem:[#allocation2 + $0x18] sm:$0xff] }
  0x6a   : > { %820 = vmatprep.subr.mxu0 %v763_v50  ;;  %710 = vmatpush1.msra.mxu1 %v639_v61  ;;  %v877_v38 = vld [vmem:[#allocation2 + $0x10] sm:$0xff]  ;;  %v876_v39 = vld [vmem:[#allocation2 + $0x8] sm:$0xff]  ;;  %v875_v40 = vld [vmem:[#allocation2] sm:$0xff] }
  0x6b   : > { %821 = vmatpush1.msra.mxu0 %v762_v52  ;;  %711 = vmatprep.subr.mxu1 %v638_v63  ;;  %v669_v44 = vld [vmem:[%s2069_s6] sm:$0x3] }
  0x6c   : > { %822 = vmatprep.subr.mxu0 %v761_v54  ;;  %712 = vmatpush1.msra.mxu1 %v637_v2  ;;  %v786_v45 = vld [vmem:[%s2071_s8] sm:$0x3]  ;;  %v674_v47 = vrot.slane %v669_v44, %v1894_v43  ;;  %v678_v49 = vrot.slane %v669_v44, %v1905_v46 }
  0x6d   : > { %823 = vmatpush1.msra.mxu0 %v760_v56  ;;  %919 = vmatprep.subr.mxu1 %v906_v5  ;;  %v791_v48 = vrot.slane %v786_v45, %v1894_v43  ;;  %v795_v50 = vrot.slane %v786_v45, %v1905_v46  ;;  %v907_v61 = vld [vmem:[%s2067_s4] sm:$0x3] }
  0x6e   : > { %824 = vmatprep.subr.mxu0 %v759_v58  ;;  %v916_v63 = vrot.slane %v907_v61, %v1905_v46 }
  0x6f   : > { %825 = vmatpush1.msra.mxu0 %v758_v60 }
  0x70   : > { %826 = vmatprep.subr.mxu0 %v757_v62  ;;  %v912_v62 = vrot.slane %v907_v61, %v1894_v43 }
  0x71   : > { %827 = vmatpush1.msra.mxu0 %v756_v1 }
  0x72   : > { %828 = vmatprep.subr.mxu0 %v755_v3 }
  0x73   : > { %829 = vmatpush1.msra.mxu0 %v754_v4 }
 0x114   : > { %v632_v7 = vpop.f32.mrf.mxu0 }
 0x115   : > { %v633_v8 = vadd.f32 %v1314_v6, %v632_v7  ;;  %v1685_v6 = vmov 0   ;;  %v1007_v7 = vld [vmem:[%s551_s21] sm:$0xff]  ;;  %s1522_s21 = scalar_lea.vmem %s1076_s25, 256 }
 0x116   : > { %v1345_v9 = vpop.f32.mrf.mxu0  ;;  %1436 = vset.pattern.permute.xlu1 %v1685_v6  ;;  %1437 = vset.pattern.permute.xlu0 %v1685_v6  ;;  %p1523_p10 = scmp.ne.s32.totalorder %s1076_s25, %s1522_s21  ;;  %p1530_p8 = scmp.lt.s32.totalorder %s1528_s2, %s1522_s21 }
 0x117   : > { %v1888_v10 = vmax.f32 %v633_v8, 0.0  ;;  %1010 = vperm.xlu1 %1436, %v1007_v7  }
 0x118   : > { %p1524_p2 = pnand %p1523_p10, %p2107_p12  ;;  %p1531_p11 = por %p1530_p8, %p1529_p7 }
 0x119   : > { %746 = vmatmul.mubr.f32.vlgmr.msra.gmra.mxu1 %v1888_v10  ;;  %863 = vmatmul.mubr.f32.vlgmr.msra.gmra.mxu0 %v1888_v10 }
 0x11a   : > { %920 = vmatpush1.msra.mxu1 %v905_v11  ;;  %983 = vmatprep.mubr.f32.mxu1 %v1683_v0  ;;  %v892_v0 = vld [vmem:[#allocation2 + $0x88] sm:$0xff]  ;;  %p1525_p4 = pneg %p1524_p2 }
 0x11b   : > { %921 = vmatprep.subr.mxu1 %v904_v12 }
 0x11c   : > { %922 = vmatpush1.msra.mxu1 %v903_v13  ;;  %p1532_p0 = pnand %p1531_p11, %p1525_p4 }
 0x11d   : > { %923 = vmatprep.subr.mxu1 %v902_v14 }
 0x11e   : > { %924 = vmatpush1.msra.mxu1 %v901_v15 }
 0x11f   : > { %925 = vmatprep.subr.mxu1 %v900_v16 }
 0x120   : > { %926 = vmatpush1.msra.mxu1 %v899_v17 }
 0x121   : > { %927 = vmatprep.subr.mxu1 %v898_v18 }
 0x122   : > { %928 = vmatpush1.msra.mxu1 %v897_v19 }
 0x123   : > { %929 = vmatprep.subr.mxu1 %v896_v20 }
 0x124   : > { %930 = vmatpush1.msra.mxu1 %v895_v21 }
 0x125   : > { %931 = vmatprep.subr.mxu1 %v894_v22 }
 0x126   : > { %932 = vmatpush1.msra.mxu1 %v893_v23 }
 0x127   : > { %933 = vmatprep.subr.mxu1 %v892_v0 }
 0x128   : > { %934 = vmatpush1.msra.mxu1 %v891_v24 }
 0x129   : > { %935 = vmatprep.subr.mxu1 %v890_v25 }
 0x12a   : > { %936 = vmatpush1.msra.mxu1 %v889_v26 }
 0x12b   : > { %937 = vmatprep.subr.mxu1 %v888_v27 }
 0x12c   : > { %938 = vmatpush1.msra.mxu1 %v887_v28 }
 0x12d   : > { %939 = vmatprep.subr.mxu1 %v886_v29 }
 0x12e   : > { %940 = vmatpush1.msra.mxu1 %v885_v30 }
 0x12f   : > { %941 = vmatprep.subr.mxu1 %v884_v31 }
 0x130   : > { %942 = vmatpush1.msra.mxu1 %v883_v32 }
 0x131   : > { %943 = vmatprep.subr.mxu1 %v882_v33 }
 0x132   : > { %944 = vmatpush1.msra.mxu1 %v881_v34 }
 0x133   : > { %945 = vmatprep.subr.mxu1 %v880_v35 }
 0x134   : > { %946 = vmatpush1.msra.mxu1 %v879_v36 }
 0x135   : > { %947 = vmatprep.subr.mxu1 %v878_v37 }
 0x136   : > { %948 = vmatpush1.msra.mxu1 %v877_v38 }
 0x137   : > { %949 = vmatprep.subr.mxu1 %v876_v39 }
 0x138   : > { %950 = vmatpush1.msra.mxu1 %v875_v40 }
 0x139   : > { %984 = vmatmul.mubr.f32.vlgmr.msra.gmra.mxu1 %v1888_v10 }
 0x1d9   : > { %v747_v51 = vpop.f32.mrf.mxu1  ;;  %v864_v52 = vpop.f32.mrf.mxu0 }
 0x1da   : > { %v748_v53 = vadd.f32 %v747_v51, %v674_v47  ;;  %v865_v54 = vadd.f32 %v864_v52, %v791_v48 }
 0x1db   : > { %v749_v55 = vpop.f32.mrf.mxu1  ;;  %v866_v56 = vpop.f32.mrf.mxu0 }
 0x1dc   : > { %752 = vst [vmem:[%s1915_s18] sm:$0xff] %v748_v53  ;;  %v1316_v57 = vclamps-f32 %v865_v54, 3.0  ;;  %v750_v58 = vadd.f32 %v749_v55, %v678_v49  ;;  %v867_v59 = vadd.f32 %v866_v56, %v795_v50 }
 0x1de   : > { %873 = vst [vmem:[%s1919_s15] sm:$0xff] %v1316_v57  ;;  %753 = vst [vmem:[%s1915_s18 + $0x8] sm:$0xff] %v750_v58  ;;  %v1317_v60 = vclamps-f32 %v867_v59, 3.0 }
 0x1e0   : > { %874 = vst [vmem:[%s1919_s15 + $0x8] sm:$0xff] %v1317_v60 }
 0x1f9   : > { %v985_v1 = vpop.f32.mrf.mxu1 }
 0x1fa   : > { %v986_v3 = vadd.f32 %v985_v1, %v912_v62 }
 0x1fb   : > { %v987_v2 = vpop.f32.mrf.mxu1 }
 0x1fc   : > { %v988_v4 = vadd.f32 %v987_v2, %v916_v63 }
 0x1fe   : > { %v990_v5 = vmax.f32 %v986_v3, %v988_v4 }
 0x200   : > { %991 = vmax.xlane.f32.xlu0 %v990_v5 }
 0x289   : > { %v992_v8 = vpop.xlane.xlu0 %991 }
 0x28a   : > { %v993_v9 = vsub.f32 %v986_v3, %v992_v8  ;;  %v994_v10 = vsub.f32 %v988_v4, %v992_v8 }
 0x28c   : > { %v995_v11 = vmul.f32 1.442695, %v993_v9  ;;  %v997_v12 = vmul.f32 1.442695, %v994_v10 }
 0x28e   : > { %1438 = vpow2.f32 %v995_v11 }
 0x28f   : > { %1440 = vpow2.f32 %v997_v12 }
 0x29b   : > { %v1934_v13 = vpop.eup %1438 }
 0x29c   : > { %v1936_v14 = vpop.eup %1440 }
 0x29d   : > { %v999_v15 = vadd.f32 %v1936_v14, %v1934_v13 }
 0x29f   : > { %1000 = vadd.xlane.f32.xlu0 %v999_v15 }
 0x2a0   : > { %1535 = shalt.err (!%p1532_p0)
}
 0x2a1   : > { %s1536_s17 = scalar_lea.hbm %s1073_s24, 256  ;;  %s1540_s26 = scalar_lea.hbm %s2075_s12, 768 }
 0x2a2   : > { %p1537_p6 = scmp.ne.s32.totalorder %s1073_s24, %s1536_s17  ;;  %p1541_p1 = scmp.lt.s32.totalorder %s1073_s24, %s2075_s12 }
 0x2a3   : > { %p1542_p5 = scmp.lt.s32.totalorder %s1540_s26, %s1536_s17 }
 0x2a4   : > { %p1538_p9 = pnand %p1537_p6, %p2107_p12 }
 0x2a5   : > { %p1543_p3 = por %p1542_p5, %p1541_p1 }
 0x2a6   : > { %p1539_p13 = pneg %p1538_p9 }
 0x2a8   : > { %p1544_p10 = pnand %p1543_p3, %p1539_p13 }
 0x2aa   : > { %1547 = shalt.err (!%p1544_p10)
}
 0x2ab   : > { %1359 = dma.vmem_to_hbm [thread:$0]  (%p2107_p12), %s1076_s25, 256, %s1073_s24, %s1949_s28  }
 0x2ac   : > { %s1101_s2 = scalar_lea.hbm %s2077_s14, %s1942_s22  ;;  %s1103_s21 = sshll.u32 %s1915_s18, 4  ;;  %s1104_s21 = int_to_ptr.vmem [resolvable:$true] %s1103_s21 }
 0x2ad   : > { %s1047_s3 = scalar_lea.sflag [#allocation13], %s1897_s27  ;;  %s1548_s15 = scalar_lea.vmem %s1104_s21, 256 }
 0x2ae   : > { %p1549_p2 = scmp.ne.s32.totalorder %s1104_s21, %s1548_s15  ;;  %s1687_s17 = smov [#allocation12]  }
 0x2af   : > { %s1552_s29 = sshll.u32 %s1687_s17, 4  ;;  %s1553_s29 = int_to_ptr.vmem [resolvable:$false] %s1552_s29 }
 0x2b0   : > { %p1550_p4 = pnand %p1549_p2, %p2107_p12  ;;  %s1554_s26 = scalar_lea.vmem %s1553_s29, 512 }
 0x2b1   : > { %p1555_p8 = scmp.lt.s32.totalorder %s1104_s21, %s1553_s29  ;;  %p1556_p11 = scmp.lt.s32.totalorder %s1554_s26, %s1548_s15 }
 0x2b2   : > { %p1551_p7 = pneg %p1550_p4 }
 0x2b3   : > { %p1557_p0 = por %p1556_p11, %p1555_p8 }
 0x2b5   : > { %p1558_p6 = pnand %p1557_p0, %p1551_p7 }
 0x2b7   : > { %1561 = shalt.err (!%p1558_p6)
}
 0x2b8   : > { %s1562_s24 = scalar_lea.hbm %s1101_s2, 256  ;;  %s1566_s19 = scalar_lea.hbm %s2077_s14, 768 }
 0x2b9   : > { %p1563_p9 = scmp.ne.s32.totalorder %s1101_s2, %s1562_s24  ;;  %p1567_p5 = scmp.lt.s32.totalorder %s1101_s2, %s2077_s14 }
 0x2ba   : > { %p1568_p3 = scmp.lt.s32.totalorder %s1566_s19, %s1562_s24 }
 0x2bb   : > { %p1564_p13 = pnand %p1563_p9, %p2107_p12 }
 0x2bc   : > { %p1569_p10 = por %p1568_p3, %p1567_p5 }
 0x2bd   : > { %p1565_p1 = pneg %p1564_p13 }
 0x2bf   : > { %p1570_p2 = pnand %p1569_p10, %p1565_p1 }
 0x2c1   : > { %1573 = shalt.err (!%p1570_p2)
}
 0x2c2   : > { %1361 = dma.vmem_to_hbm [thread:$0]  (%p2107_p12), %s1104_s21, 256, %s1101_s2, %s1047_s3   ;;  %v1015_v17 = vld [vmem:[%s2073_s10] sm:$0x3]  ;;  %v1011_v19 = vpop.permute.xlu1 %1010 }
 0x2c3   : > { %s522_s29 = scalar_lea.vmem [#allocation8], %s1908_s20  ;;  %v1020_v20 = vrot.slane %v1015_v17, %v1894_v43  ;;  %v1024_v21 = vrot.slane %v1015_v17, %v1905_v46  ;;  %s1994_s3 = scalar_lea.hbm %s2074_s11, %s1942_s22 }
 0x2c4   : > { %s1061_s26 = sshll.u32 %s522_s29, 4  ;;  %s1999_s24 = scalar_lea.vmem [#allocation11], %s1908_s20  ;;  %s1996_s26 = int_to_ptr.vmem [resolvable:$true] %s1061_s26 }
 0x2c5   : > { %s1089_s18 = sshll.u32 %s1999_s24, 4  ;;  %s1032_s25 = scalar_lea.sflag [#allocation4], %s1897_s27  ;;  %s1090_s18 = int_to_ptr.vmem [resolvable:$true] %s1089_s18 }
 0x2c6   : > { %s1574_s19 = scalar_lea.vmem %s1996_s26, 256  ;;  %s1688_s0 = smov [#allocation8]  }
 0x2c7   : > { %p1575_p4 = scmp.ne.s32.totalorder %s1996_s26, %s1574_s19  ;;  %s1578_s1 = sshll.u32 %s1688_s0, 4  ;;  %s1579_s1 = int_to_ptr.vmem [resolvable:$false] %s1578_s1 }
 0x2c8   : > { %s1580_s15 = scalar_lea.vmem %s1579_s1, 512  ;;  %p1581_p11 = scmp.lt.s32.totalorder %s1996_s26, %s1579_s1 }
 0x2c9   : > { %p1576_p7 = pnand %p1575_p4, %p2107_p12  ;;  %p1582_p0 = scmp.lt.s32.totalorder %s1580_s15, %s1574_s19 }
 0x2cb   : > { %p1577_p8 = pneg %p1576_p7  ;;  %p1583_p6 = por %p1582_p0, %p1581_p11 }
 0x2cd   : > { %p1584_p9 = pnand %p1583_p6, %p1577_p8 }
 0x328   : > { %v1001_v16 = vpop.xlane.xlu0 %1000 }
 0x329   : > { %1442 = vrcp.f32 %v1001_v16 }
 0x336   : > { %v1443_v18 = vpop.eup %1442 }
 0x337   : > { %v1003_v22 = vmul.f32 %v1443_v18, %v1934_v13  ;;  %v1004_v23 = vmul.f32 %v1443_v18, %v1936_v14 }
 0x339   : > { %1005 = vst [vmem:[%s522_s29] sm:$0xff] %v1003_v22  ;;  %1006 = vst [vmem:[%s522_s29 + $0x8] sm:$0xff] %v1004_v23  ;;  %v1013_v0 = vmul.f32 %v1011_v19, %v1003_v22  ;;  %v1014_v24 = vmul.f32 %v1011_v19, %v1004_v23 }
 0x33a   : > { %1587 = shalt.err (!%p1584_p9)
}
 0x33b   : > { %s1588_s20 = scalar_lea.hbm %s1994_s3, 256  ;;  %s1592_s29 = scalar_lea.hbm %s2074_s11, 768 }
 0x33c   : > { %p1589_p13 = scmp.ne.s32.totalorder %s1994_s3, %s1588_s20  ;;  %p1593_p3 = scmp.lt.s32.totalorder %s1994_s3, %s2074_s11 }
 0x33d   : > { %p1594_p10 = scmp.lt.s32.totalorder %s1592_s29, %s1588_s20 }
 0x33e   : > { %p1590_p1 = pnand %p1589_p13, %p2107_p12 }
 0x33f   : > { %p1595_p2 = por %p1594_p10, %p1593_p3 }
 0x340   : > { %p1591_p5 = pneg %p1590_p1 }
 0x342   : > { %p1596_p4 = pnand %p1595_p2, %p1591_p5 }
 0x344   : > { %1599 = shalt.err (!%p1596_p4)
}
 0x345   : > { %1358 = dma.vmem_to_hbm [thread:$0]  (%p2107_p12), %s1996_s26, 256, %s1994_s3, %s1032_s25   ;;  %v1027_v25 = vmul.f32 %v1020_v20, %v1013_v0  ;;  %v1028_v26 = vmul.f32 %v1024_v21, %v1014_v24 }
 0x346   : > { %s1087_s1 = scalar_lea.hbm %s2076_s13, %s1942_s22  ;;  %s1600_s15 = scalar_lea.vmem %s1090_s18, 256 }
 0x347   : > { %1029 = vst [vmem:[%s1999_s24] sm:$0xff] %v1027_v25  ;;  %1030 = vst [vmem:[%s1999_s24 + $0x8] sm:$0xff] %v1028_v26  ;;  %p1601_p7 = scmp.ne.s32.totalorder %s1090_s18, %s1600_s15  ;;  %s1689_s20 = smov [#allocation11]  }
 0x348   : > { %s1604_s27 = sshll.u32 %s1689_s20, 4  ;;  %s1605_s27 = int_to_ptr.vmem [resolvable:$false] %s1604_s27 }
 0x349   : > { %p1602_p8 = pnand %p1601_p7, %p2107_p12  ;;  %s1606_s17 = scalar_lea.vmem %s1605_s27, 512 }
 0x34a   : > { %p1607_p0 = scmp.lt.s32.totalorder %s1090_s18, %s1605_s27  ;;  %p1608_p6 = scmp.lt.s32.totalorder %s1606_s17, %s1600_s15 }
 0x34b   : > { %p1603_p11 = pneg %p1602_p8 }
 0x34c   : > { %p1609_p9 = por %p1608_p6, %p1607_p0 }
 0x34e   : > { %p1610_p13 = pnand %p1609_p9, %p1603_p11 }
 0x350   : > { %1613 = shalt.err (!%p1610_p13)
}
 0x351   : > { %s1614_s26 = scalar_lea.hbm %s1087_s1, 256  ;;  %s1618_s24 = scalar_lea.hbm %s2076_s13, 768 }
 0x352   : > { %p1615_p1 = scmp.ne.s32.totalorder %s1087_s1, %s1614_s26  ;;  %p1619_p10 = scmp.lt.s32.totalorder %s1087_s1, %s2076_s13 }
 0x353   : > { %p1620_p2 = scmp.lt.s32.totalorder %s1618_s24, %s1614_s26 }
 0x354   : > { %p1616_p5 = pnand %p1615_p1, %p2107_p12 }
 0x355   : > { %p1621_p4 = por %p1620_p2, %p1619_p10 }
 0x356   : > { %p1617_p3 = pneg %p1616_p5 }
 0x358   : > { %p1622_p7 = pnand %p1621_p4, %p1617_p3 }
 0x35a   : > { %1625 = shalt.err (!%p1622_p7)
}
 0x35b   : > { %1360 = dma.vmem_to_hbm [thread:$0]  (%p2107_p12), %s1090_s18, 256, %s1087_s1, %s1949_s28  }
 0x35c PF: > { %s2108_s2 = sld [smem:[#allocation19_spill]]  ;;  %p1395_p8 = scmp.ge.s32.totalorder %s1676_s16, 2 }
 0x35d   : > { %s2109_s21 = sld [smem:[#allocation23_spill]] }
 0x362   : > { %s1115_s19 = sand.u32 1, %s2108_s2  }
 0x363   : > { %p2110_p11 = scmp.ne.s32.totalorder %s2109_s21, 0  ;;  %s1116_s0 = scalar_lea.sflag [#allocation4], %s1115_s19 }
 0x365   : > { %p1377_p0 = pnand %p1395_p8, %p2110_p11 }
 0x367   : > { %p1378_p6 = pneg %p1377_p0 }
 0x369   : > { %1651 = dma.done.wait (%p1378_p6), %s1116_s0, 256  }
 0x36a   : > { %1653 = vsyncadd (%p1378_p6), %s1116_s0, 4294967040  ;;  %s2111_s15 = sadd.s32 4294967294, %s1676_s16  }
 0x36b   : > { %s1124_s20 = sand.u32 1, %s2111_s15  }
 0x36c   : > { %s1125_s27 = scalar_lea.sflag [#allocation10], %s1124_s20 }
 0x36d   : > { %1655 = dma.done.wait (%p1378_p6), %s1125_s27, 512  }
 0x36e   : > { %1657 = vsyncadd (%p1378_p6), %s1125_s27, 4294966784  ;;  %s1143_s23 = scalar_lea.sflag [#allocation13], %s1115_s19 }
 0x36f   : > { %1659 = dma.done.wait (%p1378_p6), %s1143_s23, 256  }
 0x370   : > { %1661 = vsyncadd (%p1378_p6), %s1143_s23, 4294967040  ;;  %s2112_s16 = sld [smem:[#allocation21_spill]]  ;;  %s2115_s29 = smov %s1668_s30 }
 0x371   : > { %s2113_s28 = sld [smem:[#allocation20_spill]] }
 0x372   : > { %s2114_s15 = sld [smem:[#allocation22_spill]] }
 0x376   : > { %p33_p12 = scmp.ge.s32.totalorder %s2112_s16, 5  }
 0x377   : > { %s2116_s30 = smov %s2113_s28 }
 0x378   :  { %35 = sbr.rel (!%p33_p12) target bundleno = 14 (0xe), region = 164 }
 0x37d   :  { %1148 = vsyncpa [#allocation3], 1 }
 0x37e   :  { %1150 = vsyncpa [#allocation3 + $0x1], 1 }
 0x37f   :  { %1151 = vsyncpa [#allocation6], 1 }
 0x380   :  { %1152 = vsyncpa [#allocation4], 1 }
 0x381   :  { %1154 = vsyncpa [#allocation4 + $0x1], 1 }
 0x382   :  { %1155 = vsyncpa [#allocation10], 1 }
 0x383   :  { %1157 = vsyncpa [#allocation10 + $0x1], 1 }
 0x384   :  { %1158 = vsyncpa [#allocation13], 1 }
 0x385   :  { %1160 = vsyncpa [#allocation13 + $0x1], 1 }

// kernel: tpu_custom_call.1
= control target key start
LH: loop header
LB: loop body
LE: loop exit
PB: predicated region body
PF: predicated region fallthrough
CT: control target
= control target key end

     0   :  { %s2063_s0 = inlined_call_operand.vmem [shape: f32[24,16], index: 0, kind: input, shape index: {}]   ;;  %s2064_s1 = inlined_call_operand.vmem [shape: f32[16,128], index: 1, kind: input, shape index: {}]   ;;  %s2065_s2 = inlined_call_operand.vmem [shape: f32[1,128], index: 2, kind: input, shape index: {}]   ;;  %s2066_s3 = inlined_call_operand.hbm [shape: f32[128,256], index: 3, kind: input, shape index: {}]   ;;  %s2067_s4 = inlined_call_operand.vmem [shape: f32[1,256], index: 4, kind: input, shape index: {}]   ;;  %s2068_s5 = inlined_call_operand.hbm [shape: f32[128,256], index: 5, kind: input, shape index: {}]   ;;  %s2069_s6 = inlined_call_operand.vmem [shape: f32[1,256], index: 6, kind: input, shape index: {}]   ;;  %s2070_s7 = inlined_call_operand.hbm [shape: f32[128,256], index: 7, kind: input, shape index: {}]   ;;  %s2071_s8 = inlined_call_operand.vmem [shape: f32[1,256], index: 8, kind: input, shape index: {}]   ;;  %s2072_s9 = inlined_call_operand.vmem [shape: f32[24,1], index: 9, kind: input, shape index: {}]   ;;  %s2073_s10 = inlined_call_operand.vmem [shape: f32[1,256], index: 10, kind: input, shape index: {}]   ;;  %s2074_s11 = inlined_call_operand.hbm [shape: f32[24,256], index: 11, kind: output, shape index: {0}]   ;;  %s2075_s12 = inlined_call_operand.hbm [shape: f32[24,256], index: 12, kind: output, shape index: {1}]   ;;  %s2076_s13 = inlined_call_operand.hbm [shape: f32[24,256], index: 13, kind: output, shape index: {2}]   ;;  %s2077_s14 = inlined_call_operand.hbm [shape: f32[24,256], index: 14, kind: output, shape index: {3}]  }
   0x1   :  { %2086 = sst [smem:[#allocation24_spill]] %s2063_s0 }
   0x2   :  { %2087 = sst [smem:[#allocation25_spill]] %s2064_s1 }
   0x3   :  { %2088 = sst [smem:[#allocation26_spill]] %s2065_s2 }
   0x4   :  { %2089 = sst [smem:[#allocation27_spill]] %s2066_s3 }
   0x5   :  { %20 = vsyncpa [#allocation3], 0 }
   0x6   :  { %21 = vsyncpa [#allocation6], 0 }
   0x7   :  { %22 = vsyncpa [#allocation4], 0 }
   0x8   :  { %24 = vsyncpa [#allocation4 + $0x1], 0 }
   0x9   :  { %25 = vsyncpa [#allocation10], 0 }
   0xa   :  { %27 = vsyncpa [#allocation10 + $0x1], 0 }
   0xb   :  { %28 = vsyncpa [#allocation13], 0 }
   0xc   :  { %30 = vsyncpa [#allocation13 + $0x1], 0  ;;  %s1765_s29 = smov 0   ;;  %s1767_s30 = smov 0  }
   0xd   :  { %s1769_s15 = smov 0   ;;  %s1771_s16 = smov 0  }
   0xe LB: > { %2090 = sst [smem:[#allocation19_spill]] %s1664_s29  ;;  %s1786_s17 = sadd.s32 4294967295, %s1676_s16   ;;  %s1676_s16 = sphi %s1771_s16, %s2112_s16   ;;  %s1672_s15 = sphi %s1769_s15, %s2114_s15   ;;  %s1668_s30 = sphi %s1767_s30, %s2116_s30   ;;  %s1664_s29 = sphi %s1765_s29, %s2115_s29  }
   0xf   : > { %2091 = sst [smem:[#allocation20_spill]] %s1672_s15  ;;  %s2078_s18 = sadd.s32 4294967294, %s1676_s16  }
  0x10   : > { %s1790_s19 = sadd.s32 1, %s1676_s16   ;;  %s284_s20 = sadd.s32 1, %s1672_s15 }
  0x11   : > { %2092 = sst [smem:[#allocation21_spill]] %s1790_s19  ;;  %s281_s21 = ssub.s32 %s1676_s16, %s1790_s19 }
  0x12   : > { %p294_p0 = scmp.ne.s32.totalorder %s1672_s15, %s1668_s30  ;;  %p282_p1 = scmp.eq.s32.totalorder %s281_s21, 0 }
  0x13   : > { %p295_p2 = scmp.eq.s32.totalorder %s1786_s17, 2  ;;  %p300_p3 = scmp.ne.s32.totalorder %s1668_s30, %s1664_s29 }
  0x14   : > { %p301_p4 = scmp.eq.s32.totalorder %s2078_s18, 2  ;;  %p1299_p7 = scmp.ge.s32.totalorder %s1676_s16, 1 }
  0x15   : > { %s1803_s22 = scalar_select %p282_p1, %s1672_s15, %s284_s20  }
  0x16   : > { %p1805_p5 = por %p295_p2, %p294_p0  ;;  %p1809_p6 = por %p301_p4, %p300_p3 }
  0x17   : > { %2093 = sst [smem:[#allocation22_spill]] %s1803_s22  ;;  %p386_p8 = scmp.lt.s32.totalorder %s1676_s16, 4 }
  0x18   : > { %s2094_s23 = scalar_select %p1805_p5, 1, 0 }
  0x19   : > { %s2095_s24 = scalar_select %p1809_p6, 1, 0 }
  0x1a   : > { %p2083_p9 = scmp.eq.s32.totalorder %s1786_s17, 0  ;;  %p1816_p10 = pnand %p1299_p7, %p386_p8 }
  0x1b   : > { %2096 = sst [smem:[#allocation23_spill]] %s2095_s24  ;;  %s1678_s26 = smov [#allocation5]  }
  0x1c   : > { %p1366_p11 = pneg %p1816_p10  ;;  %s420_s27 = sshll.u32 %s1678_s26, 4  ;;  %s421_s27 = int_to_ptr.vmem [resolvable:$true] %s420_s27 }
  0x1d   : > { %s1679_s20 = smov [#allocation2]   ;;  %s1680_s18 = smov [#allocation7]  }
  0x1e   : > { %p1824_p12 = pnand %p2083_p9, %p1366_p11  ;;  %s404_s21 = sshll.u32 %s1679_s20, 4  ;;  %s405_s21 = int_to_ptr.vmem [resolvable:$true] %s404_s21 }
  0x1f   : > { %s436_s22 = sshll.u32 %s1680_s18, 4  ;;  %s1455_s15 = scalar_lea.vmem %s421_s27, 4096  ;;  %s437_s22 = int_to_ptr.vmem [resolvable:$true] %s436_s22 }
  0x20   : > { %p1446_p13 = pneg %p1824_p12  ;;  %p1456_p0 = scmp.ne.s32.totalorder %s421_s27, %s1455_s15 }
  0x21   : > { %p1463_p3 = scmp.lt.s32.totalorder %s421_s27, %s421_s27  ;;  %p1464_p4 = scmp.lt.s32.totalorder %s1455_s15, %s1455_s15 }
  0x22   : > { %p1458_p1 = pnand %p1456_p0, %p1446_p13 }
  0x23   : > { %p1465_p7 = por %p1464_p4, %p1463_p3 }
  0x24   : > { %p1459_p2 = pneg %p1458_p1 }
  0x26   : > { %p1466_p8 = pnand %p1465_p7, %p1459_p2 }
  0x28   : > { %1469 = shalt.err (!%p1466_p8)
}
  0x29   : > { %s1681_s26 = smov 256   ;;  %s1682_s20 = smov 16  }
  0x2a   : > { %1372 = dma.hbm_to_vmem [thread:$0]  (!%p1824_p12), %s2068_s5, 4096, %s421_s27, [#allocation6], %s1681_s26, %s1681_s26, %s1682_s20  }
  0x2b   : > { %s1481_s24 = scalar_lea.vmem %s405_s21, 4096  ;;  %p1489_p9 = scmp.lt.s32.totalorder %s405_s21, %s405_s21 }
  0x2c   : > { %p1482_p11 = scmp.ne.s32.totalorder %s405_s21, %s1481_s24  ;;  %p1490_p6 = scmp.lt.s32.totalorder %s1481_s24, %s1481_s24 }
  0x2e   : > { %p1484_p0 = pnand %p1482_p11, %p1446_p13  ;;  %p1491_p3 = por %p1490_p6, %p1489_p9 }
  0x30   : > { %p1485_p1 = pneg %p1484_p0 }
  0x32   : > { %p1492_p2 = pnand %p1491_p3, %p1485_p1 }
  0x34   : > { %1495 = shalt.err (!%p1492_p2)
}
  0x35   : > { %s2099_s3 = sld [smem:[#allocation27_spill]]  ;;  %s1507_s19 = scalar_lea.vmem %s437_s22, 4096 }
  0x36   : > { %p1508_p4 = scmp.ne.s32.totalorder %s437_s22, %s1507_s19  ;;  %p1515_p11 = scmp.lt.s32.totalorder %s437_s22, %s437_s22 }
  0x37   : > { %p1516_p0 = scmp.lt.s32.totalorder %s1507_s19, %s1507_s19 }
  0x38   : > { %p1510_p7 = pnand %p1508_p4, %p1446_p13 }
  0x39   : > { %p1517_p5 = por %p1516_p0, %p1515_p11 }
  0x3a   : > { %p1511_p8 = pneg %p1510_p7 }
  0x3b   : > { %1369 = dma.hbm_to_vmem [thread:$0]  (!%p1824_p12), %s2099_s3, 4096, %s405_s21, [#allocation3], %s1681_s26, %s1681_s26, %s1682_s20  }
  0x3c   : > { %p1518_p6 = pnand %p1517_p5, %p1511_p8 }
  0x3e   : > { %1521 = shalt.err (!%p1518_p6)
}
  0x3f   : > { %1375 = dma.hbm_to_vmem [thread:$0]  (!%p1824_p12), %s2070_s7, 4096, %s437_s22, [#allocation6], %s1681_s26, %s1681_s26, %s1682_s20  }
  0x40   : > { %472 = sbr.rel (%p1816_p10) target bundleno = 860 (0x35c), region = 64  ;;  %p2100_p9 = scmp.eq.s32.totalorder (!%p1816_p10), %s1786_s17, 0 }
  0x45   : > { %1643 = dma.done.wait (%p2100_p9), [#allocation3], 4096   ;;  %p2101_p13 = pmov %p2100_p9 }
  0x46   : > { %p2102_p1 = pmov %p2100_p9 }
  0x47   : > { %1645 = vsyncadd (%p2101_p13), [#allocation3], 4294963200 }
  0x48   : > { %1647 = dma.done.wait (%p2102_p1), [#allocation6], 8192   ;;  %p2103_p5 = pmov %p2102_p1 }
  0x49   : > { %p544_p3 = scmp.lt.s32.totalorder %s1786_s17, 2  ;;  %v1683_v0 = vmov 0.0   ;;  %vm1684_vm0 = vmmov 0   ;;  %s2104_s0 = sld [smem:[#allocation24_spill]]  ;;  %vm562_vm1 = vcmask 130048   ;;  %v668_v4 = vld [vmem:[#allocation5 + $0xf8] sm:$0xff] }
  0x4a   : > { %1649 = vsyncadd (%p2103_p5), [#allocation6], 4294959104  ;;  %1339 = vmatprep.subr.mxu0 %v1683_v0  ;;  %1343 = vmatprep.mubr.msk.f32.mxu0 %vm1684_vm0, %v1683_v0  ;;  %s2105_s1 = sld [smem:[#allocation25_spill]]  ;;  %v667_v5 = vld [vmem:[#allocation5 + $0xf0] sm:$0xff]  ;;  %v785_v6 = vld [vmem:[#allocation7 + $0xf8] sm:$0xff]  ;;  %s1897_s27 = sand.u32 1, %s1668_s30  }
  0x4b   : > { %s1868_s29 = scalar_select %p544_p3, %s1786_s17, 2  ;;  %745 = vmatprep.mubr.f32.mxu1 %v1683_v0  ;;  %681 = vmatprep.subr.mxu1 %v668_v4  ;;  %v666_v7 = vld [vmem:[#allocation5 + $0xe8] sm:$0xff]  ;;  %v784_v8 = vld [vmem:[#allocation7 + $0xf0] sm:$0xff]  ;;  %v665_v9 = vld [vmem:[#allocation5 + $0xe0] sm:$0xff] }
  0x4c   : > { %682 = vmatpush1.msra.mxu1 %v667_v5  ;;  %v783_v10 = vld [vmem:[#allocation7 + $0xe8] sm:$0xff]  ;;  %v664_v11 = vld [vmem:[#allocation5 + $0xd8] sm:$0xff]  ;;  %v782_v12 = vld [vmem:[#allocation7 + $0xe0] sm:$0xff]  ;;  %s2106_s2 = sld [smem:[#allocation26_spill]]  ;;  %s1908_s20 = sshll.u32 %s1897_s27, 4 }
  0x4d   : > { %s1312_s22 = sshll.u32 %s1868_s29, 3  ;;  %683 = vmatprep.subr.mxu1 %v666_v7  ;;  %v663_v13 = vld [vmem:[#allocation5 + $0xd0] sm:$0xff]  ;;  %v781_v14 = vld [vmem:[#allocation7 + $0xd8] sm:$0xff]  ;;  %v662_v15 = vld [vmem:[#allocation5 + $0xc8] sm:$0xff]  ;;  %s1915_s18 = scalar_lea.vmem [#allocation12], %s1908_s20 }
  0x4e   : > { %684 = vmatpush1.msra.mxu1 %v665_v9  ;;  %v780_v16 = vld [vmem:[#allocation7 + $0xd0] sm:$0xff]  ;;  %v661_v17 = vld [vmem:[#allocation5 + $0xc0] sm:$0xff]  ;;  %v779_v18 = vld [vmem:[#allocation7 + $0xc8] sm:$0xff]  ;;  %s1919_s15 = scalar_lea.vmem [#allocation9], %s1908_s20  ;;  %s1036_s29 = sand.u32 1, %s1786_s17  }
  0x4f   : > { %s547_s21 = scalar_lea.vmem %s2104_s0, %s1312_s22  ;;  %685 = vmatprep.subr.mxu1 %v664_v11  ;;  %v660_v19 = vld [vmem:[#allocation5 + $0xb8] sm:$0xff]  ;;  %v778_v20 = vld [vmem:[#allocation7 + $0xc0] sm:$0xff]  ;;  %v659_v21 = vld [vmem:[#allocation5 + $0xb0] sm:$0xff]  ;;  %s1075_s25 = sshll.u32 %s1919_s15, 4  ;;  %s1076_s25 = int_to_ptr.vmem [resolvable:$true] %s1075_s25 }
  0x50   : > { %v554_v1 = vld [vmem:[%s2105_s1 + $0x8] sm:$0xff]  ;;  %v553_v2 = vld [vmem:[%s2105_s1] sm:$0xff]  ;;  %686 = vmatpush1.msra.mxu1 %v663_v13  ;;  %v777_v22 = vld [vmem:[#allocation7 + $0xb8] sm:$0xff]  ;;  %s1949_s28 = scalar_lea.sflag [#allocation10], %s1036_s29  ;;  %p2107_p12 = scmp.ne.s32.totalorder %s2094_s23, 0 }
  0x51   : > { %v552_v3 = vld [vmem:[%s547_s21] sm:$0xff]  ;;  %1340 = vmatpush3.msra.mxu0 %v554_v1  ;;  %687 = vmatprep.subr.mxu1 %v662_v15  ;;  %v658_v23 = vld [vmem:[#allocation5 + $0xa8] sm:$0xff]  ;;  %v776_v24 = vld [vmem:[#allocation7 + $0xb0] sm:$0xff]  ;;  %s551_s21 = scalar_lea.vmem %s2072_s9, %s1312_s22  ;;  %s1942_s22 = sshll.u32 %s1786_s17, 8 }
  0x52   : > { %1341 = vmatprep.subr.mxu0 %v1683_v0  ;;  %688 = vmatpush1.msra.mxu1 %v661_v17  ;;  %v657_v25 = vld [vmem:[#allocation5 + $0xa0] sm:$0xff]  ;;  %v775_v26 = vld [vmem:[#allocation7 + $0xa8] sm:$0xff]  ;;  %v656_v27 = vld [vmem:[#allocation5 + $0x98] sm:$0xff]  ;;  %s1073_s24 = scalar_lea.hbm %s2075_s12, %s1942_s22  ;;  %s1686_s0 = smov [#allocation9]  }
  0x53   : > { %1342 = vmatpush3.msra.mxu0 %v553_v2  ;;  %689 = vmatprep.subr.mxu1 %v660_v19  ;;  %v774_v28 = vld [vmem:[#allocation7 + $0xa0] sm:$0xff]  ;;  %v655_v29 = vld [vmem:[#allocation5 + $0x90] sm:$0xff]  ;;  %v773_v30 = vld [vmem:[#allocation7 + $0x98] sm:$0xff]  ;;  %s1526_s1 = sshll.u32 %s1686_s0, 4  ;;  %s1527_s1 = int_to_ptr.vmem [resolvable:$false] %s1526_s1 }
  0x54   : > { %1344 = vmatmul.mubr.msk.f32.vlgmr.msra.gmra.mxu0 %vm562_vm1, %v552_v3  ;;  %798 = vmatprep.subr.mxu0 %v785_v6  ;;  %v654_v31 = vld [vmem:[#allocation5 + $0x88] sm:$0xff]  ;;  %v772_v32 = vld [vmem:[#allocation7 + $0x90] sm:$0xff]  ;;  %v653_v33 = vld [vmem:[#allocation5 + $0x80] sm:$0xff]  ;;  %p1529_p7 = scmp.lt.s32.totalorder %s1076_s25, %s1527_s1 }
  0x55   : > { %799 = vmatpush1.msra.mxu0 %v784_v8  ;;  %690 = vmatpush1.msra.mxu1 %v659_v21  ;;  %v771_v34 = vld [vmem:[#allocation7 + $0x88] sm:$0xff]  ;;  %v652_v35 = vld [vmem:[#allocation5 + $0x78] sm:$0xff]  ;;  %v770_v36 = vld [vmem:[#allocation7 + $0x80] sm:$0xff] }
  0x56   : > { %800 = vmatprep.subr.mxu0 %v783_v10  ;;  %691 = vmatprep.subr.mxu1 %v658_v23  ;;  %v651_v37 = vld [vmem:[#allocation5 + $0x70] sm:$0xff]  ;;  %v769_v38 = vld [vmem:[#allocation7 + $0x78] sm:$0xff]  ;;  %v650_v39 = vld [vmem:[#allocation5 + $0x68] sm:$0xff] }
  0x57   : > { %801 = vmatpush1.msra.mxu0 %v782_v12  ;;  %692 = vmatpush1.msra.mxu1 %v657_v25  ;;  %v768_v40 = vld [vmem:[#allocation7 + $0x70] sm:$0xff]  ;;  %v649_v41 = vld [vmem:[#allocation5 + $0x60] sm:$0xff]  ;;  %v767_v42 = vld [vmem:[#allocation7 + $0x68] sm:$0xff] }
  0x58   : > { %802 = vmatprep.subr.mxu0 %v781_v14  ;;  %693 = vmatprep.subr.mxu1 %v656_v27  ;;  %v648_v43 = vld [vmem:[#allocation5 + $0x58] sm:$0xff]  ;;  %v766_v44 = vld [vmem:[#allocation7 + $0x60] sm:$0xff]  ;;  %v647_v45 = vld [vmem:[#allocation5 + $0x50] sm:$0xff] }
  0x59   : > { %803 = vmatpush1.msra.mxu0 %v780_v16  ;;  %694 = vmatpush1.msra.mxu1 %v655_v29  ;;  %v765_v46 = vld [vmem:[#allocation7 + $0x58] sm:$0xff]  ;;  %v646_v47 = vld [vmem:[#allocation5 + $0x48] sm:$0xff]  ;;  %v764_v48 = vld [vmem:[#allocation7 + $0x50] sm:$0xff] }
  0x5a   : > { %804 = vmatprep.subr.mxu0 %v779_v18  ;;  %695 = vmatprep.subr.mxu1 %v654_v31  ;;  %v645_v49 = vld [vmem:[#allocation5 + $0x40] sm:$0xff]  ;;  %v763_v50 = vld [vmem:[#allocation7 + $0x48] sm:$0xff]  ;;  %v644_v51 = vld [vmem:[#allocation5 + $0x38] sm:$0xff] }
  0x5b   : > { %805 = vmatpush1.msra.mxu0 %v778_v20  ;;  %696 = vmatpush1.msra.mxu1 %v653_v33  ;;  %v762_v52 = vld [vmem:[#allocation7 + $0x40] sm:$0xff]  ;;  %v643_v53 = vld [vmem:[#allocation5 + $0x30] sm:$0xff]  ;;  %v761_v54 = vld [vmem:[#allocation7 + $0x38] sm:$0xff] }
  0x5c   : > { %806 = vmatprep.subr.mxu0 %v777_v22  ;;  %697 = vmatprep.subr.mxu1 %v652_v35  ;;  %v642_v55 = vld [vmem:[#allocation5 + $0x28] sm:$0xff]  ;;  %v760_v56 = vld [vmem:[#allocation7 + $0x30] sm:$0xff]  ;;  %v641_v57 = vld [vmem:[#allocation5 + $0x20] sm:$0xff] }
  0x5d   : > { %807 = vmatpush1.msra.mxu0 %v776_v24  ;;  %698 = vmatpush1.msra.mxu1 %v651_v37  ;;  %v759_v58 = vld [vmem:[#allocation7 + $0x28] sm:$0xff]  ;;  %v640_v59 = vld [vmem:[#allocation5 + $0x18] sm:$0xff]  ;;  %v758_v60 = vld [vmem:[#allocation7 + $0x20] sm:$0xff] }
  0x5e   : > { %808 = vmatprep.subr.mxu0 %v775_v26  ;;  %699 = vmatprep.subr.mxu1 %v650_v39  ;;  %v639_v61 = vld [vmem:[#allocation5 + $0x10] sm:$0xff]  ;;  %v757_v62 = vld [vmem:[#allocation7 + $0x18] sm:$0xff]  ;;  %v638_v63 = vld [vmem:[#allocation5 + $0x8] sm:$0xff] }
  0x5f   : > { %809 = vmatpush1.msra.mxu0 %v774_v28  ;;  %700 = vmatpush1.msra.mxu1 %v649_v41  ;;  %v756_v1 = vld [vmem:[#allocation7 + $0x10] sm:$0xff]  ;;  %v637_v2 = vld [vmem:[#allocation5] sm:$0xff]  ;;  %v755_v3 = vld [vmem:[#allocation7 + $0x8] sm:$0xff]  ;;  %v671_v41 = vlaneseq }
  0x60   : > { %810 = vmatprep.subr.mxu0 %v773_v30  ;;  %701 = vmatprep.subr.mxu1 %v648_v43  ;;  %v754_v4 = vld [vmem:[#allocation7] sm:$0xff]  ;;  %v906_v5 = vld [vmem:[#allocation2 + $0xf8] sm:$0xff]  ;;  %v905_v11 = vld [vmem:[#allocation2 + $0xf0] sm:$0xff] }
  0x61   : > { %811 = vmatpush1.msra.mxu0 %v772_v32  ;;  %702 = vmatpush1.msra.mxu1 %v647_v45  ;;  %v1314_v6 = vld [vmem:[%s2106_s2] ss:$0 sm:$0xff]  ;;  %v904_v12 = vld [vmem:[#allocation2 + $0xe8] sm:$0xff]  ;;  %v902_v14 = vld [vmem:[#allocation2 + $0xd8] sm:$0xff]  ;;  %s1528_s2 = scalar_lea.vmem %s1527_s1, 512 }
  0x62   : > { %812 = vmatprep.subr.mxu0 %v771_v34  ;;  %703 = vmatprep.subr.mxu1 %v646_v47  ;;  %v903_v13 = vld [vmem:[#allocation2 + $0xe0] sm:$0xff]  ;;  %v901_v15 = vld [vmem:[#allocation2 + $0xd0] sm:$0xff]  ;;  %v900_v16 = vld [vmem:[#allocation2 + $0xc8] sm:$0xff] }
  0x63   : > { %813 = vmatpush1.msra.mxu0 %v770_v36  ;;  %704 = vmatpush1.msra.mxu1 %v645_v49  ;;  %v899_v17 = vld [vmem:[#allocation2 + $0xc0] sm:$0xff]  ;;  %v898_v18 = vld [vmem:[#allocation2 + $0xb8] sm:$0xff]  ;;  %v897_v19 = vld [vmem:[#allocation2 + $0xb0] sm:$0xff] }
  0x64   : > { %814 = vmatprep.subr.mxu0 %v769_v38  ;;  %705 = vmatprep.subr.mxu1 %v644_v51  ;;  %v896_v20 = vld [vmem:[#allocation2 + $0xa8] sm:$0xff]  ;;  %v895_v21 = vld [vmem:[#allocation2 + $0xa0] sm:$0xff]  ;;  %v894_v22 = vld [vmem:[#allocation2 + $0x98] sm:$0xff] }
  0x65   : > { %815 = vmatpush1.msra.mxu0 %v768_v40  ;;  %706 = vmatpush1.msra.mxu1 %v643_v53  ;;  %v893_v23 = vld [vmem:[#allocation2 + $0x90] sm:$0xff]  ;;  %v891_v24 = vld [vmem:[#allocation2 + $0x80] sm:$0xff]  ;;  %v890_v25 = vld [vmem:[#allocation2 + $0x78] sm:$0xff] }
  0x66   : > { %816 = vmatprep.subr.mxu0 %v767_v42  ;;  %707 = vmatprep.subr.mxu1 %v642_v55  ;;  %v889_v26 = vld [vmem:[#allocation2 + $0x70] sm:$0xff]  ;;  %v888_v27 = vld [vmem:[#allocation2 + $0x68] sm:$0xff]  ;;  %v887_v28 = vld [vmem:[#allocation2 + $0x60] sm:$0xff]  ;;  %v672_v42 = vshrl.u32 %v671_v41, 7 }
  0x67   : > { %817 = vmatpush1.msra.mxu0 %v766_v44  ;;  %708 = vmatpush1.msra.mxu1 %v641_v57  ;;  %v886_v29 = vld [vmem:[#allocation2 + $0x58] sm:$0xff]  ;;  %v885_v30 = vld [vmem:[#allocation2 + $0x50] sm:$0xff]  ;;  %v884_v31 = vld [vmem:[#allocation2 + $0x48] sm:$0xff] }
  0x68   : > { %818 = vmatprep.subr.mxu0 %v765_v46  ;;  %862 = vmatprep.mubr.f32.mxu0 %v1683_v0  ;;  %v883_v32 = vld [vmem:[#allocation2 + $0x40] sm:$0xff]  ;;  %v882_v33 = vld [vmem:[#allocation2 + $0x38] sm:$0xff]  ;;  %v881_v34 = vld [vmem:[#allocation2 + $0x30] sm:$0xff]  ;;  %v1894_v43 = vsub.s32 0, %v672_v42  ;;  %v1905_v46 = vsub.s32 1, %v672_v42 }
  0x69   : > { %819 = vmatpush1.msra.mxu0 %v764_v48  ;;  %709 = vmatprep.subr.mxu1 %v640_v59  ;;  %v880_v35 = vld [vmem:[#allocation2 + $0x28] sm:$0xff]  ;;  %v879_v36 = vld [vmem:[#allocation2 + $0x20] sm:$0xff]  ;;  %v878_v37 = vld [vmem:[#allocation2 + $0x18] sm:$0xff] }
  0x6a   : > { %820 = vmatprep.subr.mxu0 %v763_v50  ;;  %710 = vmatpush1.msra.mxu1 %v639_v61  ;;  %v877_v38 = vld [vmem:[#allocation2 + $0x10] sm:$0xff]  ;;  %v876_v39 = vld [vmem:[#allocation2 + $0x8] sm:$0xff]  ;;  %v875_v40 = vld [vmem:[#allocation2] sm:$0xff] }
  0x6b   : > { %821 = vmatpush1.msra.mxu0 %v762_v52  ;;  %711 = vmatprep.subr.mxu1 %v638_v63  ;;  %v669_v44 = vld [vmem:[%s2069_s6] sm:$0x3] }
  0x6c   : > { %822 = vmatprep.subr.mxu0 %v761_v54  ;;  %712 = vmatpush1.msra.mxu1 %v637_v2  ;;  %v786_v45 = vld [vmem:[%s2071_s8] sm:$0x3]  ;;  %v674_v47 = vrot.slane %v669_v44, %v1894_v43  ;;  %v678_v49 = vrot.slane %v669_v44, %v1905_v46 }
  0x6d   : > { %823 = vmatpush1.msra.mxu0 %v760_v56  ;;  %919 = vmatprep.subr.mxu1 %v906_v5  ;;  %v791_v48 = vrot.slane %v786_v45, %v1894_v43  ;;  %v795_v50 = vrot.slane %v786_v45, %v1905_v46  ;;  %v907_v61 = vld [vmem:[%s2067_s4] sm:$0x3] }
  0x6e   : > { %824 = vmatprep.subr.mxu0 %v759_v58  ;;  %v916_v63 = vrot.slane %v907_v61, %v1905_v46 }
  0x6f   : > { %825 = vmatpush1.msra.mxu0 %v758_v60 }
  0x70   : > { %826 = vmatprep.subr.mxu0 %v757_v62  ;;  %v912_v62 = vrot.slane %v907_v61, %v1894_v43 }
  0x71   : > { %827 = vmatpush1.msra.mxu0 %v756_v1 }
  0x72   : > { %828 = vmatprep.subr.mxu0 %v755_v3 }
  0x73   : > { %829 = vmatpush1.msra.mxu0 %v754_v4 }
 0x114   : > { %v632_v7 = vpop.f32.mrf.mxu0 }
 0x115   : > { %v633_v8 = vadd.f32 %v1314_v6, %v632_v7  ;;  %v1685_v6 = vmov 0   ;;  %v1007_v7 = vld [vmem:[%s551_s21] sm:$0xff]  ;;  %s1522_s21 = scalar_lea.vmem %s1076_s25, 256 }
 0x116   : > { %v1345_v9 = vpop.f32.mrf.mxu0  ;;  %1436 = vset.pattern.permute.xlu1 %v1685_v6  ;;  %1437 = vset.pattern.permute.xlu0 %v1685_v6  ;;  %p1523_p10 = scmp.ne.s32.totalorder %s1076_s25, %s1522_s21  ;;  %p1530_p8 = scmp.lt.s32.totalorder %s1528_s2, %s1522_s21 }
 0x117   : > { %v1888_v10 = vmax.f32 %v633_v8, 0.0  ;;  %1010 = vperm.xlu1 %1436, %v1007_v7  }
 0x118   : > { %p1524_p2 = pnand %p1523_p10, %p2107_p12  ;;  %p1531_p11 = por %p1530_p8, %p1529_p7 }
 0x119   : > { %746 = vmatmul.mubr.f32.vlgmr.msra.gmra.mxu1 %v1888_v10  ;;  %863 = vmatmul.mubr.f32.vlgmr.msra.gmra.mxu0 %v1888_v10 }
 0x11a   : > { %920 = vmatpush1.msra.mxu1 %v905_v11  ;;  %983 = vmatprep.mubr.f32.mxu1 %v1683_v0  ;;  %v892_v0 = vld [vmem:[#allocation2 + $0x88] sm:$0xff]  ;;  %p1525_p4 = pneg %p1524_p2 }
 0x11b   : > { %921 = vmatprep.subr.mxu1 %v904_v12 }
 0x11c   : > { %922 = vmatpush1.msra.mxu1 %v903_v13  ;;  %p1532_p0 = pnand %p1531_p11, %p1525_p4 }
 0x11d   : > { %923 = vmatprep.subr.mxu1 %v902_v14 }
 0x11e   : > { %924 = vmatpush1.msra.mxu1 %v901_v15 }
 0x11f   : > { %925 = vmatprep.subr.mxu1 %v900_v16 }
 0x120   : > { %926 = vmatpush1.msra.mxu1 %v899_v17 }
 0x121   : > { %927 = vmatprep.subr.mxu1 %v898_v18 }
 0x122   : > { %928 = vmatpush1.msra.mxu1 %v897_v19 }
 0x123   : > { %929 = vmatprep.subr.mxu1 %v896_v20 }
 0x124   : > { %930 = vmatpush1.msra.mxu1 %v895_v21 }
 0x125   : > { %931 = vmatprep.subr.mxu1 %v894_v22 }
 0x126   : > { %932 = vmatpush1.msra.mxu1 %v893_v23 }
 0x127   : > { %933 = vmatprep.subr.mxu1 %v892_v0 }
 0x128   : > { %934 = vmatpush1.msra.mxu1 %v891_v24 }
 0x129   : > { %935 = vmatprep.subr.mxu1 %v890_v25 }
 0x12a   : > { %936 = vmatpush1.msra.mxu1 %v889_v26 }
 0x12b   : > { %937 = vmatprep.subr.mxu1 %v888_v27 }
 0x12c   : > { %938 = vmatpush1.msra.mxu1 %v887_v28 }
 0x12d   : > { %939 = vmatprep.subr.mxu1 %v886_v29 }
 0x12e   : > { %940 = vmatpush1.msra.mxu1 %v885_v30 }
 0x12f   : > { %941 = vmatprep.subr.mxu1 %v884_v31 }
 0x130   : > { %942 = vmatpush1.msra.mxu1 %v883_v32 }
 0x131   : > { %943 = vmatprep.subr.mxu1 %v882_v33 }
 0x132   : > { %944 = vmatpush1.msra.mxu1 %v881_v34 }
 0x133   : > { %945 = vmatprep.subr.mxu1 %v880_v35 }
 0x134   : > { %946 = vmatpush1.msra.mxu1 %v879_v36 }
 0x135   : > { %947 = vmatprep.subr.mxu1 %v878_v37 }
 0x136   : > { %948 = vmatpush1.msra.mxu1 %v877_v38 }
 0x137   : > { %949 = vmatprep.subr.mxu1 %v876_v39 }
 0x138   : > { %950 = vmatpush1.msra.mxu1 %v875_v40 }
 0x139   : > { %984 = vmatmul.mubr.f32.vlgmr.msra.gmra.mxu1 %v1888_v10 }
 0x1d9   : > { %v747_v51 = vpop.f32.mrf.mxu1  ;;  %v864_v52 = vpop.f32.mrf.mxu0 }
 0x1da   : > { %v748_v53 = vadd.f32 %v747_v51, %v674_v47  ;;  %v865_v54 = vadd.f32 %v864_v52, %v791_v48 }
 0x1db   : > { %v749_v55 = vpop.f32.mrf.mxu1  ;;  %v866_v56 = vpop.f32.mrf.mxu0 }
 0x1dc   : > { %752 = vst [vmem:[%s1915_s18] sm:$0xff] %v748_v53  ;;  %v1316_v57 = vclamps-f32 %v865_v54, 3.0  ;;  %v750_v58 = vadd.f32 %v749_v55, %v678_v49  ;;  %v867_v59 = vadd.f32 %v866_v56, %v795_v50 }
 0x1de   : > { %873 = vst [vmem:[%s1919_s15] sm:$0xff] %v1316_v57  ;;  %753 = vst [vmem:[%s1915_s18 + $0x8] sm:$0xff] %v750_v58  ;;  %v1317_v60 = vclamps-f32 %v867_v59, 3.0 }
 0x1e0   : > { %874 = vst [vmem:[%s1919_s15 + $0x8] sm:$0xff] %v1317_v60 }
 0x1f9   : > { %v985_v1 = vpop.f32.mrf.mxu1 }
 0x1fa   : > { %v986_v3 = vadd.f32 %v985_v1, %v912_v62 }
 0x1fb   : > { %v987_v2 = vpop.f32.mrf.mxu1 }
 0x1fc   : > { %v988_v4 = vadd.f32 %v987_v2, %v916_v63 }
 0x1fe   : > { %v990_v5 = vmax.f32 %v986_v3, %v988_v4 }
 0x200   : > { %991 = vmax.xlane.f32.xlu0 %v990_v5 }
 0x289   : > { %v992_v8 = vpop.xlane.xlu0 %991 }
 0x28a   : > { %v993_v9 = vsub.f32 %v986_v3, %v992_v8  ;;  %v994_v10 = vsub.f32 %v988_v4, %v992_v8 }
 0x28c   : > { %v995_v11 = vmul.f32 1.442695, %v993_v9  ;;  %v997_v12 = vmul.f32 1.442695, %v994_v10 }
 0x28e   : > { %1438 = vpow2.f32 %v995_v11 }
 0x28f   : > { %1440 = vpow2.f32 %v997_v12 }
 0x29b   : > { %v1934_v13 = vpop.eup %1438 }
 0x29c   : > { %v1936_v14 = vpop.eup %1440 }
 0x29d   : > { %v999_v15 = vadd.f32 %v1936_v14, %v1934_v13 }
 0x29f   : > { %1000 = vadd.xlane.f32.xlu0 %v999_v15 }
 0x2a0   : > { %1535 = shalt.err (!%p1532_p0)
}
 0x2a1   : > { %s1536_s17 = scalar_lea.hbm %s1073_s24, 256  ;;  %s1540_s26 = scalar_lea.hbm %s2075_s12, 768 }
 0x2a2   : > { %p1537_p6 = scmp.ne.s32.totalorder %s1073_s24, %s1536_s17  ;;  %p1541_p1 = scmp.lt.s32.totalorder %s1073_s24, %s2075_s12 }
 0x2a3   : > { %p1542_p5 = scmp.lt.s32.totalorder %s1540_s26, %s1536_s17 }
 0x2a4   : > { %p1538_p9 = pnand %p1537_p6, %p2107_p12 }
 0x2a5   : > { %p1543_p3 = por %p1542_p5, %p1541_p1 }
 0x2a6   : > { %p1539_p13 = pneg %p1538_p9 }
 0x2a8   : > { %p1544_p10 = pnand %p1543_p3, %p1539_p13 }
 0x2aa   : > { %1547 = shalt.err (!%p1544_p10)
}
 0x2ab   : > { %1359 = dma.vmem_to_hbm [thread:$0]  (%p2107_p12), %s1076_s25, 256, %s1073_s24, %s1949_s28  }
 0x2ac   : > { %s1101_s2 = scalar_lea.hbm %s2077_s14, %s1942_s22  ;;  %s1103_s21 = sshll.u32 %s1915_s18, 4  ;;  %s1104_s21 = int_to_ptr.vmem [resolvable:$true] %s1103_s21 }
 0x2ad   : > { %s1047_s3 = scalar_lea.sflag [#allocation13], %s1897_s27  ;;  %s1548_s15 = scalar_lea.vmem %s1104_s21, 256 }
 0x2ae   : > { %p1549_p2 = scmp.ne.s32.totalorder %s1104_s21, %s1548_s15  ;;  %s1687_s17 = smov [#allocation12]  }
 0x2af   : > { %s1552_s29 = sshll.u32 %s1687_s17, 4  ;;  %s1553_s29 = int_to_ptr.vmem [resolvable:$false] %s1552_s29 }
 0x2b0   : > { %p1550_p4 = pnand %p1549_p2, %p2107_p12  ;;  %s1554_s26 = scalar_lea.vmem %s1553_s29, 512 }
 0x2b1   : > { %p1555_p8 = scmp.lt.s32.totalorder %s1104_s21, %s1553_s29  ;;  %p1556_p11 = scmp.lt.s32.totalorder %s1554_s26, %s1548_s15 }
 0x2b2   : > { %p1551_p7 = pneg %p1550_p4 }
 0x2b3   : > { %p1557_p0 = por %p1556_p11, %p1555_p8 }
 0x2b5   : > { %p1558_p6 = pnand %p1557_p0, %p1551_p7 }
 0x2b7   : > { %1561 = shalt.err (!%p1558_p6)
}
 0x2b8   : > { %s1562_s24 = scalar_lea.hbm %s1101_s2, 256  ;;  %s1566_s19 = scalar_lea.hbm %s2077_s14, 768 }
 0x2b9   : > { %p1563_p9 = scmp.ne.s32.totalorder %s1101_s2, %s1562_s24  ;;  %p1567_p5 = scmp.lt.s32.totalorder %s1101_s2, %s2077_s14 }
 0x2ba   : > { %p1568_p3 = scmp.lt.s32.totalorder %s1566_s19, %s1562_s24 }
 0x2bb   : > { %p1564_p13 = pnand %p1563_p9, %p2107_p12 }
 0x2bc   : > { %p1569_p10 = por %p1568_p3, %p1567_p5 }
 0x2bd   : > { %p1565_p1 = pneg %p1564_p13 }
 0x2bf   : > { %p1570_p2 = pnand %p1569_p10, %p1565_p1 }
 0x2c1   : > { %1573 = shalt.err (!%p1570_p2)
}
 0x2c2   : > { %1361 = dma.vmem_to_hbm [thread:$0]  (%p2107_p12), %s1104_s21, 256, %s1101_s2, %s1047_s3   ;;  %v1015_v17 = vld [vmem:[%s2073_s10] sm:$0x3]  ;;  %v1011_v19 = vpop.permute.xlu1 %1010 }
 0x2c3   : > { %s522_s29 = scalar_lea.vmem [#allocation8], %s1908_s20  ;;  %v1020_v20 = vrot.slane %v1015_v17, %v1894_v43  ;;  %v1024_v21 = vrot.slane %v1015_v17, %v1905_v46  ;;  %s1994_s3 = scalar_lea.hbm %s2074_s11, %s1942_s22 }
 0x2c4   : > { %s1061_s26 = sshll.u32 %s522_s29, 4  ;;  %s1999_s24 = scalar_lea.vmem [#allocation11], %s1908_s20  ;;  %s1996_s26 = int_to_ptr.vmem [resolvable:$true] %s1061_s26 }
 0x2c5   : > { %s1089_s18 = sshll.u32 %s1999_s24, 4  ;;  %s1032_s25 = scalar_lea.sflag [#allocation4], %s1897_s27  ;;  %s1090_s18 = int_to_ptr.vmem [resolvable:$true] %s1089_s18 }
 0x2c6   : > { %s1574_s19 = scalar_lea.vmem %s1996_s26, 256  ;;  %s1688_s0 = smov [#allocation8]  }
 0x2c7   : > { %p1575_p4 = scmp.ne.s32.totalorder %s1996_s26, %s1574_s19  ;;  %s1578_s1 = sshll.u32 %s1688_s0, 4  ;;  %s1579_s1 = int_to_ptr.vmem [resolvable:$false] %s1578_s1 }
 0x2c8   : > { %s1580_s15 = scalar_lea.vmem %s1579_s1, 512  ;;  %p1581_p11 = scmp.lt.s32.totalorder %s1996_s26, %s1579_s1 }
 0x2c9   : > { %p1576_p7 = pnand %p1575_p4, %p2107_p12  ;;  %p1582_p0 = scmp.lt.s32.totalorder %s1580_s15, %s1574_s19 }
 0x2cb   : > { %p1577_p8 = pneg %p1576_p7  ;;  %p1583_p6 = por %p1582_p0, %p1581_p11 }
 0x2cd   : > { %p1584_p9 = pnand %p1583_p6, %p1577_p8 }
 0x328   : > { %v1001_v16 = vpop.xlane.xlu0 %1000 }
 0x329   : > { %1442 = vrcp.f32 %v1001_v16 }
 0x336   : > { %v1443_v18 = vpop.eup %1442 }
 0x337   : > { %v1003_v22 = vmul.f32 %v1443_v18, %v1934_v13  ;;  %v1004_v23 = vmul.f32 %v1443_v18, %v1936_v14 }
 0x339   : > { %1005 = vst [vmem:[%s522_s29] sm:$0xff] %v1003_v22  ;;  %1006 = vst [vmem:[%s522_s29 + $0x8] sm:$0xff] %v1004_v23  ;;  %v1013_v0 = vmul.f32 %v1011_v19, %v1003_v22  ;;  %v1014_v24 = vmul.f32 %v1011_v19, %v1004_v23 }
 0x33a   : > { %1587 = shalt.err (!%p1584_p9)
}
 0x33b   : > { %s1588_s20 = scalar_lea.hbm %s1994_s3, 256  ;;  %s1592_s29 = scalar_lea.hbm %s2074_s11, 768 }
 0x33c   : > { %p1589_p13 = scmp.ne.s32.totalorder %s1994_s3, %s1588_s20  ;;  %p1593_p3 = scmp.lt.s32.totalorder %s1994_s3, %s2074_s11 }
 0x33d   : > { %p1594_p10 = scmp.lt.s32.totalorder %s1592_s29, %s1588_s20 }
 0x33e   : > { %p1590_p1 = pnand %p1589_p13, %p2107_p12 }
 0x33f   : > { %p1595_p2 = por %p1594_p10, %p1593_p3 }
 0x340   : > { %p1591_p5 = pneg %p1590_p1 }
 0x342   : > { %p1596_p4 = pnand %p1595_p2, %p1591_p5 }
 0x344   : > { %1599 = shalt.err (!%p1596_p4)
}
 0x345   : > { %1358 = dma.vmem_to_hbm [thread:$0]  (%p2107_p12), %s1996_s26, 256, %s1994_s3, %s1032_s25   ;;  %v1027_v25 = vmul.f32 %v1020_v20, %v1013_v0  ;;  %v1028_v26 = vmul.f32 %v1024_v21, %v1014_v24 }
 0x346   : > { %s1087_s1 = scalar_lea.hbm %s2076_s13, %s1942_s22  ;;  %s1600_s15 = scalar_lea.vmem %s1090_s18, 256 }
 0x347   : > { %1029 = vst [vmem:[%s1999_s24] sm:$0xff] %v1027_v25  ;;  %1030 = vst [vmem:[%s1999_s24 + $0x8] sm:$0xff] %v1028_v26  ;;  %p1601_p7 = scmp.ne.s32.totalorder %s1090_s18, %s1600_s15  ;;  %s1689_s20 = smov [#allocation11]  }
 0x348   : > { %s1604_s27 = sshll.u32 %s1689_s20, 4  ;;  %s1605_s27 = int_to_ptr.vmem [resolvable:$false] %s1604_s27 }
 0x349   : > { %p1602_p8 = pnand %p1601_p7, %p2107_p12  ;;  %s1606_s17 = scalar_lea.vmem %s1605_s27, 512 }
 0x34a   : > { %p1607_p0 = scmp.lt.s32.totalorder %s1090_s18, %s1605_s27  ;;  %p1608_p6 = scmp.lt.s32.totalorder %s1606_s17, %s1600_s15 }
 0x34b   : > { %p1603_p11 = pneg %p1602_p8 }
 0x34c   : > { %p1609_p9 = por %p1608_p6, %p1607_p0 }
 0x34e   : > { %p1610_p13 = pnand %p1609_p9, %p1603_p11 }
 0x350   : > { %1613 = shalt.err (!%p1610_p13)
}
 0x351   : > { %s1614_s26 = scalar_lea.hbm %s1087_s1, 256  ;;  %s1618_s24 = scalar_lea.hbm %s2076_s13, 768 }
 0x352   : > { %p1615_p1 = scmp.ne.s32.totalorder %s1087_s1, %s1614_s26  ;;  %p1619_p10 = scmp.lt.s32.totalorder %s1087_s1, %s2076_s13 }
 0x353   : > { %p1620_p2 = scmp.lt.s32.totalorder %s1618_s24, %s1614_s26 }
 0x354   : > { %p1616_p5 = pnand %p1615_p1, %p2107_p12 }
 0x355   : > { %p1621_p4 = por %p1620_p2, %p1619_p10 }
 0x356   : > { %p1617_p3 = pneg %p1616_p5 }
 0x358   : > { %p1622_p7 = pnand %p1621_p4, %p1617_p3 }
 0x35a   : > { %1625 = shalt.err (!%p1622_p7)
}
 0x35b   : > { %1360 = dma.vmem_to_hbm [thread:$0]  (%p2107_p12), %s1090_s18, 256, %s1087_s1, %s1949_s28  }
 0x35c PF: > { %s2108_s2 = sld [smem:[#allocation19_spill]]  ;;  %p1395_p8 = scmp.ge.s32.totalorder %s1676_s16, 2 }
 0x35d   : > { %s2109_s21 = sld [smem:[#allocation23_spill]] }
 0x362   : > { %s1115_s19 = sand.u32 1, %s2108_s2  }
 0x363   : > { %p2110_p11 = scmp.ne.s32.totalorder %s2109_s21, 0  ;;  %s1116_s0 = scalar_lea.sflag [#allocation4], %s1115_s19 }
 0x365   : > { %p1377_p0 = pnand %p1395_p8, %p2110_p11 }
 0x367   : > { %p1378_p6 = pneg %p1377_p0 }
 0x369   : > { %1651 = dma.done.wait (%p1378_p6), %s1116_s0, 256  }
 0x36a   : > { %1653 = vsyncadd (%p1378_p6), %s1116_s0, 4294967040  ;;  %s2111_s15 = sadd.s32 4294967294, %s1676_s16  }
 0x36b   : > { %s1124_s20 = sand.u32 1, %s2111_s15  }
 0x36c   : > { %s1125_s27 = scalar_lea.sflag [#allocation10], %s1124_s20 }
 0x36d   : > { %1655 = dma.done.wait (%p1378_p6), %s1125_s27, 512  }
 0x36e   : > { %1657 = vsyncadd (%p1378_p6), %s1125_s27, 4294966784  ;;  %s1143_s23 = scalar_lea.sflag [#allocation13], %s1115_s19 }
 0x36f   : > { %1659 = dma.done.wait (%p1378_p6), %s1143_s23, 256  }
 0x370   : > { %1661 = vsyncadd (%p1378_p6), %s1143_s23, 4294967040  ;;  %s2112_s16 = sld [smem:[#allocation21_spill]]  ;;  %s2115_s29 = smov %s1668_s30 }
 0x371   : > { %s2113_s28 = sld [smem:[#allocation20_spill]] }
 0x372   : > { %s2114_s15 = sld [smem:[#allocation22_spill]] }
 0x376   : > { %p33_p12 = scmp.ge.s32.totalorder %s2112_s16, 5  }
 0x377   : > { %s2116_s30 = smov %s2113_s28 }
 0x378   :  { %35 = sbr.rel (!%p33_p12) target bundleno = 14 (0xe), region = 164 }
 0x37d   :  { %1148 = vsyncpa [#allocation3], 1 }
 0x37e   :  { %1150 = vsyncpa [#allocation3 + $0x1], 1 }
 0x37f   :  { %1151 = vsyncpa [#allocation6], 1 }
 0x380   :  { %1152 = vsyncpa [#allocation4], 1 }
 0x381   :  { %1154 = vsyncpa [#allocation4 + $0x1], 1 }
 0x382   :  { %1155 = vsyncpa [#allocation10], 1 }
 0x383   :  { %1157 = vsyncpa [#allocation10 + $0x1], 1 }
 0x384   :  { %1158 = vsyncpa [#allocation13], 1 }
 0x385   :  { %1160 = vsyncpa [#allocation13 + $0x1], 1 }

</bundles_post_ra>
